<compile_context>
chip_gen: v6e
topology: v6e:2x2x1
jax: 0.10.0
libtpu: 0.0.40
codegen_flags: <defaults>
</compile_context>

<pallas_src>
import jax
import jax.numpy as jnp
from jax.experimental import pallas as pl
from jax.experimental.pallas import tpu as pltpu

D_IN = 32 * 32      # 1024
D_H = 512
D_OUT = 10
D_OUT_PAD = 128     # pad logits to one full lane width (unmasked, lane-dense stores)
TB_MAX = 512        # max batch tile (review: 512-row tiles sit ~85% of roofline)


def mlp_kernel(x_ref, w1_ref, b1_ref, w2_ref, b2_ref, w3_ref, b3_ref, o_ref):
    x = x_ref[...]
    if x.dtype != jnp.bfloat16:          # trace-time branch: no cast when x arrives bf16
        x = x.astype(jnp.bfloat16)
    h1 = jnp.dot(x, w1_ref[...], preferred_element_type=jnp.float32) + b1_ref[...]
    h1 = jnp.maximum(h1, 0.0).astype(jnp.bfloat16)     # bias/ReLU in f32, cast for MXU
    h2 = jnp.dot(h1, w2_ref[...], preferred_element_type=jnp.float32) + b2_ref[...]
    h2 = jnp.maximum(h2, 0.0).astype(jnp.bfloat16)
    logits = jnp.dot(h2, w3_ref[...], preferred_element_type=jnp.float32) + b3_ref[...]
    o_ref[...] = logits.astype(o_ref.dtype)            # lane-dense (TB, 128) store


def _round_up(n, m):
    return ((n + m - 1) // m) * m


def _pick_batch_tile(b):
    if b <= 8:
        return b                       # full-dim block; no wasted DMA/MXU rows
    return min(TB_MAX, _round_up(b, 8))


def _batch_dim_semantics():
    """Explicit per-TensorCore split on v7x; plain 'parallel' elsewhere."""
    core_par = getattr(pltpu, "CORE_PARALLEL", None)
    try:
        kind = jax.devices()[0].device_kind.lower()
    except Exception:
        kind = ""
    if core_par is not None and ("v7" in kind or "tpu7" in kind):
        return (core_par,)
    return ("parallel",)


def neural_network_forward(x, params, *, return_padded=False):
    """x: (B, 32, 32) or pre-flattened (B, 1024), f32 or bf16.
    params: (w1, b1, w2, b2, w3p, b3p) from prepare_params (bf16 weights in
    (in, out) layout, f32 biases, last layer zero-padded to D_OUT_PAD cols).

    Returns (B, 10) f32 logits, or the padded lane-dense (B, 128) buffer when
    return_padded=True (columns 10..127 are exactly zero by construction).
    """
    w1, b1, w2, b2, w3, b3 = params
    B = x.shape[0]
    if x.ndim > 2:
        # nn.Flatten.  NOTE: this reshape is a real relayout pass in XLA; for
        # peak throughput hand in x already flattened to (B, 1024) (bf16 on v6e).
        x = x.reshape(B, -1)
    assert x.shape[1] == D_IN, f"expected {D_IN} flattened features, got {x.shape[1]}"

    tb = _pick_batch_tile(B)
    num_tiles = pl.cdiv(B, tb)           # ragged last block handled by Pallas (masked)

    batch_spec = lambda shape: pl.BlockSpec(shape, lambda i: (i, 0))
    const_spec = lambda shape: pl.BlockSpec(shape, lambda i: (0, 0))

    def call(dim_sem):
        return pl.pallas_call(
            mlp_kernel,
            out_shape=jax.ShapeDtypeStruct((B, D_OUT_PAD), jnp.float32),
            grid=(num_tiles,),
            in_specs=[
                batch_spec((tb, D_IN)),         # x tile, pipelined over batch
                const_spec((D_IN, D_H)),        # w1 (bf16), VMEM-resident
                const_spec((1, D_H)),           # b1 (f32)
                const_spec((D_H, D_H)),         # w2 (bf16)
                const_spec((1, D_H)),           # b2 (f32)
                const_spec((D_H, D_OUT_PAD)),   # w3 padded (bf16)
                const_spec((1, D_OUT_PAD)),     # b3 padded (f32)
            ],
            out_specs=batch_spec((tb, D_OUT_PAD)),
            compiler_params=pltpu.CompilerParams(
                dimension_semantics=dim_sem,
                vmem_limit_bytes=32 << 20,      # <= ~12 MiB used even at TB=512
            ),
        )(x, w1, b1, w2, b2, w3, b3)

    semantics_options = [_batch_dim_semantics()]
    if semantics_options[0] != ("parallel",):
        semantics_options.append(("parallel",))   # fallback if CORE_PARALLEL rejected

    out_pad = None
    last_err = None
    for sem in semantics_options:
        try:
            out_pad = call(sem)
            break
        except Exception as e:            # pragma: no cover - semantics fallback
            last_err = e
    if out_pad is None:
        raise last_err

    if return_padded:
        return out_pad                     # (B, 128); cols 10..127 are exact zeros
    return out_pad[:, :D_OUT]


def init_params(key):
    """Deterministic f32 parameter init (Kaiming-uniform-ish, like nn.Linear)."""
    ks = jax.random.split(key, 6)

    def linear(kw, kb, fan_in, fan_out):
        bound = 1.0 / jnp.sqrt(fan_in)
        w = jax.random.uniform(kw, (fan_in, fan_out), jnp.float32, -bound, bound)
        b = jax.random.uniform(kb, (1, fan_out), jnp.float32, -bound, bound)
        return w, b

    w1, b1 = linear(ks[0], ks[1], D_IN, D_H)
    w2, b2 = linear(ks[2], ks[3], D_H, D_H)
    w3, b3 = linear(ks[4], ks[5], D_H, D_OUT)
    return (w1, b1, w2, b2, w3, b3)


def prepare_params(params_f32):
    """Cast weights to bf16 for HBM/MXU, keep biases f32, zero-pad the last
    layer to D_OUT_PAD lanes (padded logit columns are exactly zero)."""
    w1, b1, w2, b2, w3, b3 = params_f32
    w3p = jnp.zeros((D_H, D_OUT_PAD), jnp.float32).at[:, :D_OUT].set(w3)
    b3p = jnp.zeros((1, D_OUT_PAD), jnp.float32).at[:, :D_OUT].set(b3)
    return (
        w1.astype(jnp.bfloat16), b1,
        w2.astype(jnp.bfloat16), b2,
        w3p.astype(jnp.bfloat16), b3p,
    )


def reference_forward(x, params_f32):
    """Pure-JAX reference mimicking the kernel's bf16-operand / f32-accum math."""
    w1, b1, w2, b2, w3, b3 = params_f32
    bf = jnp.bfloat16
    xf = x.reshape(x.shape[0], D_IN).astype(bf)
    h1 = jnp.dot(xf, w1.astype(bf), preferred_element_type=jnp.float32) + b1
    h1 = jnp.maximum(h1, 0.0).astype(bf)
    h2 = jnp.dot(h1, w2.astype(bf), preferred_element_type=jnp.float32) + b2
    h2 = jnp.maximum(h2, 0.0).astype(bf)
    return jnp.dot(h2, w3.astype(bf), preferred_element_type=jnp.float32) + b3


if __name__ == "__main__":
    key = jax.random.PRNGKey(0)
    kx, kp = jax.random.split(key)

    B = 2
    x = jax.random.normal(kx, (B, 32, 32), jnp.float32)
    params_f32 = init_params(kp)
    params = prepare_params(params_f32)
    ref = reference_forward(x, params_f32)

    # Default path: f32 (B, 32, 32) input, exactly like the PyTorch module.
    out = neural_network_forward(x, params)
    out = jax.block_until_ready(out)
    assert out.shape == (B, D_OUT)
    assert jnp.allclose(out, ref, atol=2e-2, rtol=2e-2), "mismatch vs reference (f32 path)"

    # Optimized ingestion path: producer hands in pre-flattened bf16 (B, 1024)
    # (halves the dominant input HBM stream on v6e; no in-kernel cast).
    x_bf16_flat = x.reshape(B, D_IN).astype(jnp.bfloat16)
    out_fast = neural_network_forward(x_bf16_flat, params)
    out_fast = jax.block_until_ready(out_fast)
    assert out_fast.shape == (B, D_OUT)
    assert jnp.allclose(out_fast, ref, atol=2e-2, rtol=2e-2), "mismatch vs reference (bf16 path)"

    print("KERNEL_OK")
</pallas_src>

<mosaic_0001>
module attributes {stable_mosaic.version = 11 : i64} {
  func.func @mlp_kernel(%arg0: i32, %arg1: memref<2x1024xf32, #tpu.memory_space<vmem>>, %arg2: memref<1024x512xbf16, #tpu.memory_space<vmem>>, %arg3: memref<1x512xf32, #tpu.memory_space<vmem>>, %arg4: memref<512x512xbf16, #tpu.memory_space<vmem>>, %arg5: memref<1x512xf32, #tpu.memory_space<vmem>>, %arg6: memref<512x128xbf16, #tpu.memory_space<vmem>>, %arg7: memref<1x128xf32, #tpu.memory_space<vmem>>, %arg8: memref<2x128xf32, #tpu.memory_space<vmem>>) attributes {dimension_semantics = [#tpu.dimension_semantics<parallel>], iteration_bounds = array<i64: 1>, scalar_prefetch = 0 : i64, scratch_operands = 0 : i64, tpu.core_type = #tpu.core_type<tc>, window_params = [{transform_indices = @transform_0, window_bounds = array<i64: 2, 1024>}, {pipeline_mode = #tpu.pipeline_mode<synchronous>, transform_indices = @transform_1, window_bounds = array<i64: 1024, 512>}, {pipeline_mode = #tpu.pipeline_mode<synchronous>, transform_indices = @transform_2, window_bounds = array<i64: 1, 512>}, {pipeline_mode = #tpu.pipeline_mode<synchronous>, transform_indices = @transform_3, window_bounds = array<i64: 512, 512>}, {pipeline_mode = #tpu.pipeline_mode<synchronous>, transform_indices = @transform_4, window_bounds = array<i64: 1, 512>}, {pipeline_mode = #tpu.pipeline_mode<synchronous>, transform_indices = @transform_5, window_bounds = array<i64: 512, 128>}, {pipeline_mode = #tpu.pipeline_mode<synchronous>, transform_indices = @transform_6, window_bounds = array<i64: 1, 128>}, {transform_indices = @transform_7, window_bounds = array<i64: 2, 128>}]} {
    %c0 = arith.constant 0 : index
    %c0_0 = arith.constant 0 : index
    %0 = vector.load %arg1[%c0, %c0_0] : memref<2x1024xf32, #tpu.memory_space<vmem>>, vector<2x1024xf32>
    %1 = arith.truncf %0 : vector<2x1024xf32> to vector<2x1024xbf16>
    %c0_1 = arith.constant 0 : index
    %c0_2 = arith.constant 0 : index
    %2 = vector.load %arg2[%c0_1, %c0_2] : memref<1024x512xbf16, #tpu.memory_space<vmem>>, vector<1024x512xbf16>
    %cst = arith.constant dense<0.000000e+00> : vector<2x512xf32>
    %3 = tpu.matmul %1, %2, %cst {dimension_numbers = #tpu.dot_dimension_numbers<[1], [0], [0], [1], [0, 0, 1, 1], [], []>} : vector<2x1024xbf16>, vector<1024x512xbf16>, vector<2x512xf32> -> vector<2x512xf32>
    %c0_3 = arith.constant 0 : index
    %c0_4 = arith.constant 0 : index
    %4 = vector.load %arg3[%c0_3, %c0_4] : memref<1x512xf32, #tpu.memory_space<vmem>>, vector<1x512xf32>
    %5 = vector.broadcast %4 : vector<1x512xf32> to vector<2x512xf32>
    %6 = arith.addf %3, %5 : vector<2x512xf32>
    %cst_5 = arith.constant 0.000000e+00 : f32
    %7 = vector.broadcast %cst_5 : f32 to vector<2x512xf32>
    %8 = arith.maximumf %6, %7 : vector<2x512xf32>
    %9 = arith.truncf %8 : vector<2x512xf32> to vector<2x512xbf16>
    %c0_6 = arith.constant 0 : index
    %c0_7 = arith.constant 0 : index
    %10 = vector.load %arg4[%c0_6, %c0_7] : memref<512x512xbf16, #tpu.memory_space<vmem>>, vector<512x512xbf16>
    %cst_8 = arith.constant dense<0.000000e+00> : vector<2x512xf32>
    %11 = tpu.matmul %9, %10, %cst_8 {dimension_numbers = #tpu.dot_dimension_numbers<[1], [0], [0], [1], [0, 0, 1, 1], [], []>} : vector<2x512xbf16>, vector<512x512xbf16>, vector<2x512xf32> -> vector<2x512xf32>
    %c0_9 = arith.constant 0 : index
    %c0_10 = arith.constant 0 : index
    %12 = vector.load %arg5[%c0_9, %c0_10] : memref<1x512xf32, #tpu.memory_space<vmem>>, vector<1x512xf32>
    %13 = vector.broadcast %12 : vector<1x512xf32> to vector<2x512xf32>
    %14 = arith.addf %11, %13 : vector<2x512xf32>
    %cst_11 = arith.constant 0.000000e+00 : f32
    %15 = vector.broadcast %cst_11 : f32 to vector<2x512xf32>
    %16 = arith.maximumf %14, %15 : vector<2x512xf32>
    %17 = arith.truncf %16 : vector<2x512xf32> to vector<2x512xbf16>
    %c0_12 = arith.constant 0 : index
    %c0_13 = arith.constant 0 : index
    %18 = vector.load %arg6[%c0_12, %c0_13] : memref<512x128xbf16, #tpu.memory_space<vmem>>, vector<512x128xbf16>
    %cst_14 = arith.constant dense<0.000000e+00> : vector<2x128xf32>
    %19 = tpu.matmul %17, %18, %cst_14 {dimension_numbers = #tpu.dot_dimension_numbers<[1], [0], [0], [1], [0, 0, 1, 1], [], []>} : vector<2x512xbf16>, vector<512x128xbf16>, vector<2x128xf32> -> vector<2x128xf32>
    %c0_15 = arith.constant 0 : index
    %c0_16 = arith.constant 0 : index
    %20 = vector.load %arg7[%c0_15, %c0_16] : memref<1x128xf32, #tpu.memory_space<vmem>>, vector<1x128xf32>
    %21 = vector.broadcast %20 : vector<1x128xf32> to vector<2x128xf32>
    %22 = arith.addf %19, %21 : vector<2x128xf32>
    %c0_17 = arith.constant 0 : index
    %c0_18 = arith.constant 0 : index
    %23 = vector.load %arg8[%c0_17, %c0_18] : memref<2x128xf32, #tpu.memory_space<vmem>>, vector<2x128xf32>
    tpu.vector_store %arg8[%c0_17, %c0_18], %22 {strides = array<i32>} : memref<2x128xf32, #tpu.memory_space<vmem>>, vector<2x128xf32>,
    return
  }
  func.func @transform_0(%arg0: i32) -> (i32, i32) {
    %c0_i32 = arith.constant 0 : i32
    %c0_i32_0 = arith.constant 0 : i32
    return %arg0, %c0_i32 : i32, i32
  }
  func.func @transform_1(%arg0: i32) -> (i32, i32) {
    %c0_i32 = arith.constant 0 : i32
    %c0_i32_0 = arith.constant 0 : i32
    %c0_i32_1 = arith.constant 0 : i32
    return %c0_i32, %c0_i32_0 : i32, i32
  }
  func.func @transform_2(%arg0: i32) -> (i32, i32) {
    %c0_i32 = arith.constant 0 : i32
    %c0_i32_0 = arith.constant 0 : i32
    %c0_i32_1 = arith.constant 0 : i32
    return %c0_i32, %c0_i32_0 : i32, i32
  }
  func.func @transform_3(%arg0: i32) -> (i32, i32) {
    %c0_i32 = arith.constant 0 : i32
    %c0_i32_0 = arith.constant 0 : i32
    %c0_i32_1 = arith.constant 0 : i32
    return %c0_i32, %c0_i32_0 : i32, i32
  }
  func.func @transform_4(%arg0: i32) -> (i32, i32) {
    %c0_i32 = arith.constant 0 : i32
    %c0_i32_0 = arith.constant 0 : i32
    %c0_i32_1 = arith.constant 0 : i32
    return %c0_i32, %c0_i32_0 : i32, i32
  }
  func.func @transform_5(%arg0: i32) -> (i32, i32) {
    %c0_i32 = arith.constant 0 : i32
    %c0_i32_0 = arith.constant 0 : i32
    %c0_i32_1 = arith.constant 0 : i32
    return %c0_i32, %c0_i32_0 : i32, i32
  }
  func.func @transform_6(%arg0: i32) -> (i32, i32) {
    %c0_i32 = arith.constant 0 : i32
    %c0_i32_0 = arith.constant 0 : i32
    %c0_i32_1 = arith.constant 0 : i32
    return %c0_i32, %c0_i32_0 : i32, i32
  }
  func.func @transform_7(%arg0: i32) -> (i32, i32) {
    %c0_i32 = arith.constant 0 : i32
    %c0_i32_0 = arith.constant 0 : i32
    return %arg0, %c0_i32 : i32, i32
  }
}

</mosaic_0001>

<bundles_post_ra>
// kernel: tpu_custom_call.1
= control target key start
LH: loop header
LB: loop body
LE: loop exit
PB: predicated region body
PF: predicated region fallthrough
CT: control target
= control target key end

     0   :  { %12 = vsyncpa [#allocation3], 0  ;;  %s4747_s0 = inlined_call_operand.hbm [shape: f32[2,1024], index: 0, kind: input, shape index: {}]   ;;  %s4748_s1 = inlined_call_operand.hbm [shape: bf16[1024,512], index: 1, kind: input, shape index: {}]   ;;  %s4749_s2 = inlined_call_operand.hbm [shape: f32[1,512], index: 2, kind: input, shape index: {}]   ;;  %s4750_s3 = inlined_call_operand.hbm [shape: bf16[512,512], index: 3, kind: input, shape index: {}]   ;;  %s4751_s4 = inlined_call_operand.vmem [shape: f32[1,512], index: 4, kind: input, shape index: {}]   ;;  %s4752_s5 = inlined_call_operand.hbm [shape: bf16[512,128], index: 5, kind: input, shape index: {}]   ;;  %s4753_s6 = inlined_call_operand.vmem [shape: f32[1,128], index: 6, kind: input, shape index: {}]   ;;  %s4754_s7 = inlined_call_operand.hbm [shape: f32[2,128], index: 7, kind: output, shape index: {}]  }
   0x1   :  { %13 = vsyncpa [#allocation6], 0 }
   0x2   :  { %14 = vsyncpa [#allocation9], 0 }
   0x3   :  { %15 = vsyncpa [#allocation4], 0  ;;  %s4573_s24 = smov [#allocation5]  }
   0x4   :  { %s31_s25 = sshll.u32 %s4573_s24, 4  ;;  %s32_s25 = int_to_ptr.vmem [resolvable:$true] %s31_s25 }
   0x5   :  { %s4453_s26 = scalar_lea.vmem %s32_s25, 32768  ;;  %p4458_p1 = scmp.lt.s32.totalorder %s32_s25, %s32_s25 }
   0x6   :  { %p4454_p0 = scmp.ne.s32.totalorder %s32_s25, %s4453_s26  ;;  %p4459_p2 = scmp.lt.s32.totalorder %s4453_s26, %s4453_s26 }
   0x8   :  { %p4460_p3 = por %p4459_p2, %p4458_p1 }
   0xa   :  { %p4461_p4 = pnand %p4460_p3, %p4454_p0 }
   0xc   :  { %4464 = shalt.err (!%p4461_p4)
}
   0xd   :  { %s4574_s27 = smov 256   ;;  %s4575_s28 = smov 16  }
   0xe   :  { %37 = dma.hbm_to_vmem [thread:$0]  %s4748_s1, 32768, %s32_s25, [#allocation6], %s4574_s27, %s4574_s27, %s4575_s28  }
   0xf   :  { %s4576_s8 = smov [#allocation8]   ;;  %s4577_s10 = smov [#allocation2]  }
  0x10   :  { %s53_s9 = sshll.u32 %s4576_s8, 4  ;;  %s22_s11 = sshll.u32 %s4577_s10, 4  ;;  %s54_s9 = int_to_ptr.vmem [resolvable:$true] %s53_s9  ;;  %s23_s11 = int_to_ptr.vmem [resolvable:$true] %s22_s11 }
  0x11   :  { %s4473_s12 = scalar_lea.vmem %s54_s9, 16384  ;;  %p4478_p6 = scmp.lt.s32.totalorder %s54_s9, %s54_s9 }
  0x12   :  { %p4474_p5 = scmp.ne.s32.totalorder %s54_s9, %s4473_s12  ;;  %p4479_p7 = scmp.lt.s32.totalorder %s4473_s12, %s4473_s12 }
  0x14   :  { %p4480_p8 = por %p4479_p7, %p4478_p6 }
  0x16   :  { %p4481_p9 = pnand %p4480_p8, %p4474_p5 }
  0x18   :  { %4484 = shalt.err (!%p4481_p9)
}
  0x19   :  { %59 = dma.hbm_to_vmem [thread:$0]  %s4750_s3, 16384, %s54_s9, [#allocation9], %s4574_s27, %s4574_s27, %s4575_s28  }
  0x1a   :  { %s4493_s15 = scalar_lea.vmem %s23_s11, 256  ;;  %p4498_p11 = scmp.lt.s32.totalorder %s23_s11, %s23_s11 }
  0x1b   :  { %p4494_p10 = scmp.ne.s32.totalorder %s23_s11, %s4493_s15  ;;  %p4499_p12 = scmp.lt.s32.totalorder %s4493_s15, %s4493_s15 }
  0x1d   :  { %p4500_p13 = por %p4499_p12, %p4498_p11 }
  0x1f   :  { %p4501_p0 = pnand %p4500_p13, %p4494_p10 }
  0x21   :  { %4504 = shalt.err (!%p4501_p0)
}
  0x22   :  { %25 = dma.hbm_to_vmem [thread:$0]  %s4747_s0, 256, %s23_s11, [#allocation3]  }
  0x23   :  { %s4578_s17 = smov [#allocation7]   ;;  %s4579_s19 = smov [#allocation10]  }
  0x24   :  { %s44_s18 = sshll.u32 %s4578_s17, 4  ;;  %s67_s20 = sshll.u32 %s4579_s19, 4  ;;  %s45_s18 = int_to_ptr.vmem [resolvable:$true] %s44_s18  ;;  %s68_s20 = int_to_ptr.vmem [resolvable:$true] %s67_s20 }
  0x25   :  { %s4513_s21 = scalar_lea.vmem %s45_s18, 64  ;;  %p4518_p2 = scmp.lt.s32.totalorder %s45_s18, %s45_s18 }
  0x26   :  { %p4514_p1 = scmp.ne.s32.totalorder %s45_s18, %s4513_s21  ;;  %p4519_p3 = scmp.lt.s32.totalorder %s4513_s21, %s4513_s21 }
  0x28   :  { %p4520_p4 = por %p4519_p3, %p4518_p2 }
  0x2a   :  { %p4521_p5 = pnand %p4520_p4, %p4514_p1 }
  0x2c   :  { %4524 = shalt.err (!%p4521_p5)
}
  0x2d   :  { %47 = dma.hbm_to_vmem [thread:$0]  %s4749_s2, 64, %s45_s18, [#allocation6]  }
  0x2e   :  { %s4533_s23 = scalar_lea.vmem %s68_s20, 4096  ;;  %p4538_p7 = scmp.lt.s32.totalorder %s68_s20, %s68_s20 }
  0x2f   :  { %p4534_p6 = scmp.ne.s32.totalorder %s68_s20, %s4533_s23  ;;  %p4539_p8 = scmp.lt.s32.totalorder %s4533_s23, %s4533_s23 }
  0x31   :  { %p4540_p9 = por %p4539_p8, %p4538_p7 }
  0x33   :  { %p4541_p10 = pnand %p4540_p9, %p4534_p6 }
  0x35   :  { %4544 = shalt.err (!%p4541_p10)
}
  0x36   :  { %s4580_s0 = smov 64   ;;  %s4581_s24 = smov 4  }
  0x37   :  { %73 = dma.hbm_to_vmem [thread:$0]  %s4752_s5, 4096, %s68_s20, [#allocation9], %s4580_s0, %s4580_s0, %s4581_s24  }
  0x38   :  { %4565 = dma.done.wait [#allocation3], 256  }
  0x39   :  { %4566 = vsyncadd [#allocation3], 4294967040 }
  0x3a   :  { %4567 = dma.done.wait [#allocation6], 32832  }
  0x3b   :  { %4568 = vsyncadd [#allocation6], 4294934464 }
  0x3c   :  { %4569 = dma.done.wait [#allocation9], 20480  }
  0x3d   :  { %4570 = vsyncadd [#allocation9], 4294946816  ;;  %v3835_v0 = vld [vmem:[#allocation5 + $0xe4] ss:$16 sps:$4 sm:$0xff]   ;;  %v3839_v2 = vld [vmem:[#allocation5 + $0xe0] ss:$16 sps:$4 sm:$0xff]   ;;  %v100_v38 = vlaneseq }
  0x3e   :  { %v3837_v1 = vld [vmem:[#allocation5 + $0x2e4] ss:$16 sps:$4 sm:$0xff]   ;;  %1704 = vmatprep.subr.bf16.mxu0 %v3835_v0  ;;  %v3840_v3 = vld [vmem:[#allocation5 + $0x2e0] ss:$16 sps:$4 sm:$0xff]   ;;  %v4582_v36 = vmov 1983009808  }
  0x3f   :  { %1745 = vmatprep.subr.bf16.mxu1 %v3837_v1  ;;  %v3841_v4 = vld [vmem:[#allocation5 + $0xc4] ss:$16 sps:$4 sm:$0xff]   ;;  %1705 = vmatpush1.bf16.msra.mxu0 %v3839_v2  ;;  %v3845_v6 = vld [vmem:[#allocation5 + $0xc0] ss:$16 sps:$4 sm:$0xff]   ;;  %v98_v37 = vunpack.c.l.s4 %v4582_v36  ;;  %v4639_v43 = vshrl.u32 %v100_v38, 7  ;;  %s4583_s28 = smov [#allocation11]  }
  0x40   :  { %1746 = vmatpush1.bf16.msra.mxu1 %v3840_v3  ;;  %v3843_v5 = vld [vmem:[#allocation5 + $0x2c4] ss:$16 sps:$4 sm:$0xff]   ;;  %1706 = vmatprep.subr.bf16.mxu0 %v3841_v4  ;;  %v3846_v7 = vld [vmem:[#allocation5 + $0x2c0] ss:$16 sps:$4 sm:$0xff]   ;;  %s3352_s29 = sshll.u32 %s4583_s28, 4  ;;  %s3353_s29 = int_to_ptr.vmem [resolvable:$true] %s3352_s29 }
  0x41   :  { %1747 = vmatprep.subr.bf16.mxu1 %v3843_v5  ;;  %v3847_v8 = vld [vmem:[#allocation5 + $0xa4] ss:$16 sps:$4 sm:$0xff]   ;;  %v3851_v10 = vld [vmem:[#allocation5 + $0xa0] ss:$16 sps:$4 sm:$0xff]   ;;  %v99_v42 = vunpack.c.0.s8 %v98_v37  ;;  %s4545_s30 = scalar_lea.vmem %s3353_s29, 32  ;;  %p4550_p12 = scmp.lt.s32.totalorder %s3353_s29, %s3353_s29 }
  0x42   :  { %v3849_v9 = vld [vmem:[#allocation5 + $0x2a4] ss:$16 sps:$4 sm:$0xff]   ;;  %v3852_v11 = vld [vmem:[#allocation5 + $0x2a0] ss:$16 sps:$4 sm:$0xff]   ;;  %p4546_p11 = scmp.ne.s32.totalorder %s3353_s29, %s4545_s30  ;;  %p4551_p13 = scmp.lt.s32.totalorder %s4545_s30, %s4545_s30 }
  0x43   :  { %1707 = vmatpush1.bf16.msra.mxu0 %v3845_v6  ;;  %v3853_v12 = vld [vmem:[#allocation5 + $0x84] ss:$16 sps:$4 sm:$0xff]   ;;  %v3857_v14 = vld [vmem:[#allocation5 + $0x80] ss:$16 sps:$4 sm:$0xff]   ;;  %v4642_v49 = vsub.s32 %v99_v42, %v4639_v43  ;;  %v93_v42 = vld [vmem:[#allocation2 + $0x8] sm:$0xff] }
  0x44   :  { %1748 = vmatpush1.bf16.msra.mxu1 %v3846_v7  ;;  %1708 = vmatprep.subr.bf16.mxu0 %v3847_v8  ;;  %v3855_v13 = vld [vmem:[#allocation5 + $0x284] ss:$16 sps:$4 sm:$0xff]   ;;  %v3858_v15 = vld [vmem:[#allocation5 + $0x280] ss:$16 sps:$4 sm:$0xff]   ;;  %p4552_p0 = por %p4551_p13, %p4550_p12 }
  0x45   :  { %1749 = vmatprep.subr.bf16.mxu1 %v3849_v9  ;;  %v3859_v16 = vld [vmem:[#allocation5 + $0x64] ss:$16 sps:$4 sm:$0xff]   ;;  %v3863_v18 = vld [vmem:[#allocation5 + $0x60] ss:$16 sps:$4 sm:$0xff]  }
  0x46   :  { %v3861_v17 = vld [vmem:[#allocation5 + $0x264] ss:$16 sps:$4 sm:$0xff]   ;;  %v3864_v19 = vld [vmem:[#allocation5 + $0x260] ss:$16 sps:$4 sm:$0xff]   ;;  %p4553_p1 = pnand %p4552_p0, %p4546_p11 }
  0x47   :  { %1709 = vmatpush1.bf16.msra.mxu0 %v3851_v10  ;;  %v3865_v20 = vld [vmem:[#allocation5 + $0x44] ss:$16 sps:$4 sm:$0xff]   ;;  %v3869_v22 = vld [vmem:[#allocation5 + $0x40] ss:$16 sps:$4 sm:$0xff]  }
  0x48   :  { %1750 = vmatpush1.bf16.msra.mxu1 %v3852_v11  ;;  %1710 = vmatprep.subr.bf16.mxu0 %v3853_v12  ;;  %v3867_v21 = vld [vmem:[#allocation5 + $0x244] ss:$16 sps:$4 sm:$0xff]   ;;  %v3870_v23 = vld [vmem:[#allocation5 + $0x240] ss:$16 sps:$4 sm:$0xff]  }
  0x49   :  { %1751 = vmatprep.subr.bf16.mxu1 %v3855_v13  ;;  %v3871_v24 = vld [vmem:[#allocation5 + $0x24] ss:$16 sps:$4 sm:$0xff]   ;;  %v3875_v26 = vld [vmem:[#allocation5 + $0x20] ss:$16 sps:$4 sm:$0xff]  }
  0x4a   :  { %v3873_v25 = vld [vmem:[#allocation5 + $0x224] ss:$16 sps:$4 sm:$0xff]   ;;  %v3876_v27 = vld [vmem:[#allocation5 + $0x220] ss:$16 sps:$4 sm:$0xff]  }
  0x4b   :  { %1711 = vmatpush1.bf16.msra.mxu0 %v3857_v14  ;;  %v3877_v28 = vld [vmem:[#allocation5 + $0x4] ss:$16 sps:$4 sm:$0xff]   ;;  %v3881_v30 = vld [vmem:[#allocation5] ss:$16 sps:$4 sm:$0xff]  }
  0x4c   :  { %1752 = vmatpush1.bf16.msra.mxu1 %v3858_v15  ;;  %1712 = vmatprep.subr.bf16.mxu0 %v3859_v16  ;;  %v3879_v29 = vld [vmem:[#allocation5 + $0x204] ss:$16 sps:$4 sm:$0xff]   ;;  %v3882_v31 = vld [vmem:[#allocation5 + $0x200] ss:$16 sps:$4 sm:$0xff]  }
  0x4d   :  { %1753 = vmatprep.subr.bf16.mxu1 %v3861_v17  ;;  %v3883_v32 = vld [vmem:[#allocation5 + $0x1e4] ss:$16 sps:$4 sm:$0xff]   ;;  %v3887_v34 = vld [vmem:[#allocation5 + $0x1e0] ss:$16 sps:$4 sm:$0xff]  }
  0x4e   :  { %v3885_v33 = vld [vmem:[#allocation5 + $0x3e4] ss:$16 sps:$4 sm:$0xff]   ;;  %v3888_v35 = vld [vmem:[#allocation5 + $0x3e0] ss:$16 sps:$4 sm:$0xff]  }
  0x4f   :  { %1713 = vmatpush1.bf16.msra.mxu0 %v3863_v18  ;;  %v3889_v39 = vld [vmem:[#allocation5 + $0x1c4] ss:$16 sps:$4 sm:$0xff]   ;;  %v3893_v41 = vld [vmem:[#allocation5 + $0x1c0] ss:$16 sps:$4 sm:$0xff]  }
  0x50   :  { %1754 = vmatpush1.bf16.msra.mxu1 %v3864_v19  ;;  %1714 = vmatprep.subr.bf16.mxu0 %v3865_v20  ;;  %v3891_v40 = vld [vmem:[#allocation5 + $0x3c4] ss:$16 sps:$4 sm:$0xff]   ;;  %v3894_v44 = vld [vmem:[#allocation5 + $0x3c0] ss:$16 sps:$4 sm:$0xff]  }
  0x51   :  { %1755 = vmatprep.subr.bf16.mxu1 %v3867_v21  ;;  %v3895_v45 = vld [vmem:[#allocation5 + $0x1a4] ss:$16 sps:$4 sm:$0xff]   ;;  %v3899_v47 = vld [vmem:[#allocation5 + $0x1a0] ss:$16 sps:$4 sm:$0xff]  }
  0x52   :  { %v3897_v46 = vld [vmem:[#allocation5 + $0x3a4] ss:$16 sps:$4 sm:$0xff]   ;;  %v3900_v48 = vld [vmem:[#allocation5 + $0x3a0] ss:$16 sps:$4 sm:$0xff]  }
  0x53   :  { %1715 = vmatpush1.bf16.msra.mxu0 %v3869_v22  ;;  %v3901_v50 = vld [vmem:[#allocation5 + $0x184] ss:$16 sps:$4 sm:$0xff]   ;;  %v3905_v53 = vld [vmem:[#allocation5 + $0x180] ss:$16 sps:$4 sm:$0xff]  }
  0x54   :  { %1756 = vmatpush1.bf16.msra.mxu1 %v3870_v23  ;;  %1716 = vmatprep.subr.bf16.mxu0 %v3871_v24  ;;  %v3903_v51 = vld [vmem:[#allocation5 + $0x384] ss:$16 sps:$4 sm:$0xff]   ;;  %v3906_v56 = vld [vmem:[#allocation5 + $0x380] ss:$16 sps:$4 sm:$0xff]  }
  0x55   :  { %1757 = vmatprep.subr.bf16.mxu1 %v3873_v25  ;;  %v92_v52 = vld [vmem:[#allocation2] sm:$0xff] }
  0x56   :  { %v103_v54 = vrot.slane %v92_v52, %v4642_v49  ;;  %v96_v55 = vcombine.high %v92_v52, %v92_v52  ;;  %v3907_v57 = vld [vmem:[#allocation5 + $0x164] ss:$16 sps:$4 sm:$0xff]   ;;  %v3911_v61 = vld [vmem:[#allocation5 + $0x160] ss:$16 sps:$4 sm:$0xff]  }
  0x57   :  { %1717 = vmatpush1.bf16.msra.mxu0 %v3875_v26  ;;  %v3909_v58 = vld [vmem:[#allocation5 + $0x364] ss:$16 sps:$4 sm:$0xff]   ;;  %v3912_v0 = vld [vmem:[#allocation5 + $0x360] ss:$16 sps:$4 sm:$0xff]  }
  0x58   :  { %1758 = vmatpush1.bf16.msra.mxu1 %v3876_v27  ;;  %1718 = vmatprep.subr.bf16.mxu0 %v3877_v28  ;;  %v111_v59 = vcombine.high %v103_v54, %v103_v54  ;;  %v110_v60 = vrot.slane %v96_v55, %v4642_v49  ;;  %v3913_v1 = vld [vmem:[#allocation5 + $0x144] ss:$16 sps:$4 sm:$0xff]   ;;  %v3917_v4 = vld [vmem:[#allocation5 + $0x140] ss:$16 sps:$4 sm:$0xff]   ;;  %v4652_v16 = vpack.c.bf16 %v103_v54, %v103_v54 }
  0x59   :  { %1759 = vmatprep.subr.bf16.mxu1 %v3879_v29  ;;  %v3915_v2 = vld [vmem:[#allocation5 + $0x344] ss:$16 sps:$4 sm:$0xff]   ;;  %v3918_v5 = vld [vmem:[#allocation5 + $0x340] ss:$16 sps:$4 sm:$0xff]  }
  0x5a   :  { %v4646_v62 = vpack.c.bf16 %v111_v59, %v111_v59  ;;  %v112_v63 = vcombine.high %v110_v60, %v110_v60  ;;  %v3919_v6 = vld [vmem:[#allocation5 + $0x124] ss:$16 sps:$4 sm:$0xff]   ;;  %v3923_v8 = vld [vmem:[#allocation5 + $0x120] ss:$16 sps:$4 sm:$0xff]   ;;  %v4654_v17 = vpack.c.bf16 %v110_v60, %v110_v60 }
  0x5b   :  { %1719 = vmatpush1.bf16.msra.mxu0 %v3881_v30  ;;  %v3921_v7 = vld [vmem:[#allocation5 + $0x324] ss:$16 sps:$4 sm:$0xff]   ;;  %v3924_v9 = vld [vmem:[#allocation5 + $0x320] ss:$16 sps:$4 sm:$0xff]  }
  0x5c   :  { %1760 = vmatpush1.bf16.msra.mxu1 %v3882_v31  ;;  %1720 = vmatprep.subr.bf16.mxu0 %v3883_v32  ;;  %v4648_v3 = vpack.c.bf16 %v112_v63, %v112_v63  ;;  %v3925_v10 = vld [vmem:[#allocation5 + $0x104] ss:$16 sps:$4 sm:$0xff]   ;;  %v3929_v12 = vld [vmem:[#allocation5 + $0x100] ss:$16 sps:$4 sm:$0xff]  }
  0x5d   :  { %1761 = vmatprep.subr.bf16.mxu1 %v3885_v33  ;;  %1736 = vmatprep.mubr.bf16.mxu0 %v4646_v62  ;;  %v3927_v11 = vld [vmem:[#allocation5 + $0x304] ss:$16 sps:$4 sm:$0xff]   ;;  %v3930_v13 = vld [vmem:[#allocation5 + $0x300] ss:$16 sps:$4 sm:$0xff]  }
  0x5e   :  { %1777 = vmatprep.mubr.bf16.mxu1 %v4648_v3  ;;  %v3934_v14 = vld [vmem:[#allocation5 + $0x4e4] ss:$16 sps:$4 sm:$0xff]   ;;  %v3932_v18 = vld [vmem:[#allocation5 + $0x4e0] ss:$16 sps:$4 sm:$0xff]  }
  0x5f   :  { %1721 = vmatpush2.bf16.msra.mxu0 %v3887_v34  ;;  %v3937_v15 = vld [vmem:[#allocation5 + $0x6e4] ss:$16 sps:$4 sm:$0xff]   ;;  %v3935_v19 = vld [vmem:[#allocation5 + $0x6e0] ss:$16 sps:$4 sm:$0xff]  }
  0x60   :  { %1762 = vmatpush2.bf16.msra.mxu1 %v3888_v35  ;;  %1722 = vmatprep.subr.bf16.mxu0 %v3889_v39  ;;  %v3940_v20 = vld [vmem:[#allocation5 + $0x4c4] ss:$16 sps:$4 sm:$0xff]   ;;  %v3938_v22 = vld [vmem:[#allocation5 + $0x4c0] ss:$16 sps:$4 sm:$0xff]  }
  0x61   :  { %1763 = vmatprep.subr.bf16.mxu1 %v3891_v40  ;;  %v3943_v21 = vld [vmem:[#allocation5 + $0x6c4] ss:$16 sps:$4 sm:$0xff]   ;;  %v3941_v23 = vld [vmem:[#allocation5 + $0x6c0] ss:$16 sps:$4 sm:$0xff]  }
  0x62   :  { %v3946_v24 = vld [vmem:[#allocation5 + $0x4a4] ss:$16 sps:$4 sm:$0xff]   ;;  %v3944_v26 = vld [vmem:[#allocation5 + $0x4a0] ss:$16 sps:$4 sm:$0xff]  }
  0x63   :  { %1723 = vmatpush2.bf16.msra.mxu0 %v3893_v41  ;;  %v3949_v25 = vld [vmem:[#allocation5 + $0x6a4] ss:$16 sps:$4 sm:$0xff]   ;;  %v3947_v27 = vld [vmem:[#allocation5 + $0x6a0] ss:$16 sps:$4 sm:$0xff]  }
  0x64   :  { %1764 = vmatpush2.bf16.msra.mxu1 %v3894_v44  ;;  %1724 = vmatprep.subr.bf16.mxu0 %v3895_v45  ;;  %v3952_v28 = vld [vmem:[#allocation5 + $0x484] ss:$16 sps:$4 sm:$0xff]   ;;  %v3950_v30 = vld [vmem:[#allocation5 + $0x480] ss:$16 sps:$4 sm:$0xff]   ;;  %v4659_v44 = vrot.slane %v93_v42, %v4642_v49  ;;  %v113_v45 = vcombine.high %v93_v42, %v93_v42  ;;  %v4044_v42 = vld [vmem:[#allocation5 + $0x2a8] ss:$16 sps:$4 sm:$0xff]  }
  0x65   :  { %1765 = vmatprep.subr.bf16.mxu1 %v3897_v46  ;;  %v3955_v29 = vld [vmem:[#allocation5 + $0x684] ss:$16 sps:$4 sm:$0xff]   ;;  %v3953_v31 = vld [vmem:[#allocation5 + $0x680] ss:$16 sps:$4 sm:$0xff]  }
  0x66   :  { %v3958_v32 = vld [vmem:[#allocation5 + $0x464] ss:$16 sps:$4 sm:$0xff]   ;;  %v3956_v34 = vld [vmem:[#allocation5 + $0x460] ss:$16 sps:$4 sm:$0xff]  }
  0x67   :  { %1725 = vmatpush2.bf16.msra.mxu0 %v3899_v47  ;;  %v3961_v33 = vld [vmem:[#allocation5 + $0x664] ss:$16 sps:$4 sm:$0xff]   ;;  %v3959_v35 = vld [vmem:[#allocation5 + $0x660] ss:$16 sps:$4 sm:$0xff]  }
  0x68   :  { %1766 = vmatpush2.bf16.msra.mxu1 %v3900_v48  ;;  %1726 = vmatprep.subr.bf16.mxu0 %v3901_v50  ;;  %v3964_v36 = vld [vmem:[#allocation5 + $0x444] ss:$16 sps:$4 sm:$0xff]   ;;  %v3962_v38 = vld [vmem:[#allocation5 + $0x440] ss:$16 sps:$4 sm:$0xff]   ;;  %v128_v48 = vcombine.high %v4659_v44, %v4659_v44  ;;  %v4664_v50 = vrot.slane %v113_v45, %v4642_v49  ;;  %v4052_v45 = vld [vmem:[#allocation5 + $0x28c] ss:$16 sps:$4 sm:$0xff]  }
  0x69   :  { %1767 = vmatprep.subr.bf16.mxu1 %v3903_v51  ;;  %v3967_v37 = vld [vmem:[#allocation5 + $0x644] ss:$16 sps:$4 sm:$0xff]   ;;  %v3965_v39 = vld [vmem:[#allocation5 + $0x640] ss:$16 sps:$4 sm:$0xff]  }
  0x6a   :  { %v3970_v40 = vld [vmem:[#allocation5 + $0x424] ss:$16 sps:$4 sm:$0xff]   ;;  %v3968_v46 = vld [vmem:[#allocation5 + $0x420] ss:$16 sps:$4 sm:$0xff]   ;;  %v129_v54 = vcombine.high %v4664_v50, %v4664_v50 }
  0x6b   :  { %1727 = vmatpush2.bf16.msra.mxu0 %v3905_v53  ;;  %v3973_v41 = vld [vmem:[#allocation5 + $0x624] ss:$16 sps:$4 sm:$0xff]   ;;  %v3971_v47 = vld [vmem:[#allocation5 + $0x620] ss:$16 sps:$4 sm:$0xff]   ;;  %v4666_v53 = vpack.c.bf16 %v128_v48, %v128_v48  ;;  %v4055_v48 = vld [vmem:[#allocation5 + $0x6c] ss:$16 sps:$4 sm:$0xff]  }
  0x6c   :  { %1768 = vmatpush2.bf16.msra.mxu1 %v3906_v56  ;;  %1728 = vmatprep.subr.bf16.mxu0 %v3907_v57  ;;  %v3976_v51 = vld [vmem:[#allocation5 + $0x404] ss:$16 sps:$4 sm:$0xff]   ;;  %v3974_v55 = vld [vmem:[#allocation5 + $0x400] ss:$16 sps:$4 sm:$0xff]   ;;  %v4670_v57 = vpack.c.bf16 %v129_v54, %v129_v54  ;;  %v4059_v54 = vld [vmem:[#allocation5 + $0x48] ss:$16 sps:$4 sm:$0xff]  }
  0x6d   :  { %1769 = vmatprep.subr.bf16.mxu1 %v3909_v58  ;;  %v3979_v52 = vld [vmem:[#allocation5 + $0x604] ss:$16 sps:$4 sm:$0xff]   ;;  %v3977_v56 = vld [vmem:[#allocation5 + $0x600] ss:$16 sps:$4 sm:$0xff]  }
  0x6e   :  { %v3982_v58 = vld [vmem:[#allocation5 + $0x5e4] ss:$16 sps:$4 sm:$0xff]   ;;  %v3980_v59 = vld [vmem:[#allocation5 + $0x5e0] ss:$16 sps:$4 sm:$0xff]  }
  0x6f   :  { %1729 = vmatpush2.bf16.msra.mxu0 %v3911_v61  ;;  %v3985_v49 = vld [vmem:[#allocation5 + $0x7e4] ss:$16 sps:$4 sm:$0xff]   ;;  %v3983_v60 = vld [vmem:[#allocation5 + $0x7e0] ss:$16 sps:$4 sm:$0xff]  }
  0x70   :  { %1770 = vmatpush2.bf16.msra.mxu1 %v3912_v0  ;;  %1730 = vmatprep.subr.bf16.mxu0 %v3913_v1  ;;  %v3988_v61 = vld [vmem:[#allocation5 + $0x5c4] ss:$16 sps:$4 sm:$0xff]   ;;  %v3986_v0 = vld [vmem:[#allocation5 + $0x5c0] ss:$16 sps:$4 sm:$0xff]  }
  0x71   :  { %1771 = vmatprep.subr.bf16.mxu1 %v3915_v2  ;;  %v3991_v63 = vld [vmem:[#allocation5 + $0x7c4] ss:$16 sps:$4 sm:$0xff]   ;;  %v3989_v1 = vld [vmem:[#allocation5 + $0x7c0] ss:$16 sps:$4 sm:$0xff]  }
  0x72   :  { %v3994_v2 = vld [vmem:[#allocation5 + $0x5a4] ss:$16 sps:$4 sm:$0xff]  }
  0x73   :  { %1731 = vmatpush2.bf16.msra.mxu0 %v3917_v4  ;;  %v3997_v4 = vld [vmem:[#allocation5 + $0x7a4] ss:$16 sps:$4 sm:$0xff]  }
  0x74   :  { %1772 = vmatpush2.bf16.msra.mxu1 %v3918_v5  ;;  %1732 = vmatprep.subr.bf16.mxu0 %v3919_v6  ;;  %v3992_v5 = vld [vmem:[#allocation5 + $0x5a0] ss:$16 sps:$4 sm:$0xff]  }
  0x75   :  { %1773 = vmatprep.subr.bf16.mxu1 %v3921_v7  ;;  %v3995_v6 = vld [vmem:[#allocation5 + $0x7a0] ss:$16 sps:$4 sm:$0xff]   ;;  %v4000_v7 = vld [vmem:[#allocation5 + $0x584] ss:$16 sps:$4 sm:$0xff]  }
  0x77   :  { %1733 = vmatpush2.bf16.msra.mxu0 %v3923_v8  ;;  %v4003_v8 = vld [vmem:[#allocation5 + $0x784] ss:$16 sps:$4 sm:$0xff]  }
  0x78   :  { %1774 = vmatpush2.bf16.msra.mxu1 %v3924_v9  ;;  %1734 = vmatprep.subr.bf16.mxu0 %v3925_v10  ;;  %v3998_v9 = vld [vmem:[#allocation5 + $0x580] ss:$16 sps:$4 sm:$0xff]  }
  0x79   :  { %1775 = vmatprep.subr.bf16.mxu1 %v3927_v11  ;;  %v4001_v10 = vld [vmem:[#allocation5 + $0x780] ss:$16 sps:$4 sm:$0xff]   ;;  %v4006_v11 = vld [vmem:[#allocation5 + $0x564] ss:$16 sps:$4 sm:$0xff]  }
  0x7b   :  { %1735 = vmatpush2.bf16.msra.mxu0 %v3929_v12  ;;  %v4009_v12 = vld [vmem:[#allocation5 + $0x764] ss:$16 sps:$4 sm:$0xff]  }
  0x7c   :  { %1776 = vmatpush2.bf16.msra.mxu1 %v3930_v13  ;;  %1786 = vmatprep.subr.bf16.mxu0 %v3934_v14  ;;  %v4004_v13 = vld [vmem:[#allocation5 + $0x560] ss:$16 sps:$4 sm:$0xff]  }
  0x7d   :  { %1827 = vmatprep.subr.bf16.mxu1 %v3937_v15  ;;  %v4007_v14 = vld [vmem:[#allocation5 + $0x760] ss:$16 sps:$4 sm:$0xff]   ;;  %v4012_v15 = vld [vmem:[#allocation5 + $0x544] ss:$16 sps:$4 sm:$0xff]  }
  0x7e   :  { %1737 = vmatmul.mubr.bf16.vlgmr.msra.gmra.mxu0 %v4652_v16 }
  0x7f   :  { %1778 = vmatmul.mubr.bf16.vlgmr.msra.gmra.mxu1 %v4654_v17  ;;  %1787 = vmatpush1.bf16.msra.mxu0 %v3932_v18  ;;  %v4015_v18 = vld [vmem:[#allocation5 + $0x744] ss:$16 sps:$4 sm:$0xff]  }
  0x80   :  { %1828 = vmatpush1.bf16.msra.mxu1 %v3935_v19  ;;  %1788 = vmatprep.subr.bf16.mxu0 %v3940_v20  ;;  %v4010_v19 = vld [vmem:[#allocation5 + $0x540] ss:$16 sps:$4 sm:$0xff]  }
  0x81   :  { %1829 = vmatprep.subr.bf16.mxu1 %v3943_v21  ;;  %1818 = vmatprep.mubr.bf16.mxu0 %v4666_v53  ;;  %v4013_v20 = vld [vmem:[#allocation5 + $0x740] ss:$16 sps:$4 sm:$0xff]   ;;  %v4018_v21 = vld [vmem:[#allocation5 + $0x524] ss:$16 sps:$4 sm:$0xff]  }
  0x82   :  { %1859 = vmatprep.mubr.bf16.mxu1 %v4670_v57 }
  0x83   :  { %1789 = vmatpush1.bf16.msra.mxu0 %v3938_v22  ;;  %v4021_v22 = vld [vmem:[#allocation5 + $0x724] ss:$16 sps:$4 sm:$0xff]  }
  0x84   :  { %1830 = vmatpush1.bf16.msra.mxu1 %v3941_v23  ;;  %1790 = vmatprep.subr.bf16.mxu0 %v3946_v24  ;;  %v4016_v23 = vld [vmem:[#allocation5 + $0x520] ss:$16 sps:$4 sm:$0xff]  }
  0x85   :  { %1831 = vmatprep.subr.bf16.mxu1 %v3949_v25  ;;  %v4019_v24 = vld [vmem:[#allocation5 + $0x720] ss:$16 sps:$4 sm:$0xff]   ;;  %v4024_v25 = vld [vmem:[#allocation5 + $0x504] ss:$16 sps:$4 sm:$0xff]  }
  0x87   :  { %1791 = vmatpush1.bf16.msra.mxu0 %v3944_v26  ;;  %v4027_v26 = vld [vmem:[#allocation5 + $0x704] ss:$16 sps:$4 sm:$0xff]  }
  0x88   :  { %1832 = vmatpush1.bf16.msra.mxu1 %v3947_v27  ;;  %1792 = vmatprep.subr.bf16.mxu0 %v3952_v28  ;;  %v4022_v27 = vld [vmem:[#allocation5 + $0x500] ss:$16 sps:$4 sm:$0xff]  }
  0x89   :  { %1833 = vmatprep.subr.bf16.mxu1 %v3955_v29  ;;  %v4025_v28 = vld [vmem:[#allocation5 + $0x700] ss:$16 sps:$4 sm:$0xff]   ;;  %v4031_v29 = vld [vmem:[#allocation5 + $0xec] ss:$16 sps:$4 sm:$0xff]  }
  0x8b   :  { %1793 = vmatpush1.bf16.msra.mxu0 %v3950_v30  ;;  %v4034_v30 = vld [vmem:[#allocation5 + $0x2ec] ss:$16 sps:$4 sm:$0xff]  }
  0x8c   :  { %1834 = vmatpush1.bf16.msra.mxu1 %v3953_v31  ;;  %1794 = vmatprep.subr.bf16.mxu0 %v3958_v32  ;;  %v4676_v31 = vpack.c.bf16 %v4659_v44, %v4659_v44  ;;  %v4680_v32 = vpack.c.bf16 %v4664_v50, %v4664_v50  ;;  %v4049_v44 = vld [vmem:[#allocation5 + $0x8c] ss:$16 sps:$4 sm:$0xff]  }
  0x8d   :  { %1835 = vmatprep.subr.bf16.mxu1 %v3961_v33  ;;  %v4029_v33 = vld [vmem:[#allocation5 + $0xe8] ss:$16 sps:$4 sm:$0xff]   ;;  %v4058_v50 = vld [vmem:[#allocation5 + $0x26c] ss:$16 sps:$4 sm:$0xff]  }
  0x8f   :  { %1795 = vmatpush1.bf16.msra.mxu0 %v3956_v34  ;;  %v4032_v34 = vld [vmem:[#allocation5 + $0x2e8] ss:$16 sps:$4 sm:$0xff]  }
  0x90   :  { %1836 = vmatpush1.bf16.msra.mxu1 %v3959_v35  ;;  %1796 = vmatprep.subr.bf16.mxu0 %v3964_v36  ;;  %v4037_v35 = vld [vmem:[#allocation5 + $0xcc] ss:$16 sps:$4 sm:$0xff]  }
  0x91   :  { %1837 = vmatprep.subr.bf16.mxu1 %v3967_v37  ;;  %v4040_v36 = vld [vmem:[#allocation5 + $0x2cc] ss:$16 sps:$4 sm:$0xff]   ;;  %v4035_v37 = vld [vmem:[#allocation5 + $0xc8] ss:$16 sps:$4 sm:$0xff]  }
  0x93   :  { %1797 = vmatpush1.bf16.msra.mxu0 %v3962_v38  ;;  %v4038_v38 = vld [vmem:[#allocation5 + $0x2c8] ss:$16 sps:$4 sm:$0xff]  }
  0x94   :  { %1838 = vmatpush1.bf16.msra.mxu1 %v3965_v39  ;;  %1798 = vmatprep.subr.bf16.mxu0 %v3970_v40  ;;  %v4043_v39 = vld [vmem:[#allocation5 + $0xac] ss:$16 sps:$4 sm:$0xff]  }
  0x95   :  { %1839 = vmatprep.subr.bf16.mxu1 %v3973_v41  ;;  %v4046_v40 = vld [vmem:[#allocation5 + $0x2ac] ss:$16 sps:$4 sm:$0xff]   ;;  %v4041_v41 = vld [vmem:[#allocation5 + $0xa8] ss:$16 sps:$4 sm:$0xff]  }
  0x97   :  { %1799 = vmatpush1.bf16.msra.mxu0 %v3968_v46  ;;  %v4047_v46 = vld [vmem:[#allocation5 + $0x88] ss:$16 sps:$4 sm:$0xff]  }
  0x98   :  { %1840 = vmatpush1.bf16.msra.mxu1 %v3971_v47  ;;  %1800 = vmatprep.subr.bf16.mxu0 %v3976_v51  ;;  %v4050_v47 = vld [vmem:[#allocation5 + $0x288] ss:$16 sps:$4 sm:$0xff]   ;;  %v4061_v51 = vld [vmem:[#allocation5 + $0x4c] ss:$16 sps:$4 sm:$0xff]  }
  0x99   :  { %1841 = vmatprep.subr.bf16.mxu1 %v3979_v52  ;;  %v4064_v52 = vld [vmem:[#allocation5 + $0x24c] ss:$16 sps:$4 sm:$0xff]  }
  0x9b   :  { %1801 = vmatpush1.bf16.msra.mxu0 %v3974_v55  ;;  %v4062_v55 = vld [vmem:[#allocation5 + $0x248] ss:$16 sps:$4 sm:$0xff]  }
  0x9c   :  { %1842 = vmatpush1.bf16.msra.mxu1 %v3977_v56  ;;  %1802 = vmatprep.subr.bf16.mxu0 %v3982_v58  ;;  %v4067_v56 = vld [vmem:[#allocation5 + $0x2c] ss:$16 sps:$4 sm:$0xff]  }
  0x9d   :  { %1843 = vmatprep.subr.bf16.mxu1 %v3985_v49  ;;  %v4070_v58 = vld [vmem:[#allocation5 + $0x22c] ss:$16 sps:$4 sm:$0xff]   ;;  %v4065_v49 = vld [vmem:[#allocation5 + $0x28] ss:$16 sps:$4 sm:$0xff]  }
  0x9f   :  { %1803 = vmatpush2.bf16.msra.mxu0 %v3980_v59  ;;  %v4068_v59 = vld [vmem:[#allocation5 + $0x228] ss:$16 sps:$4 sm:$0xff]  }
  0xa0   :  { %1844 = vmatpush2.bf16.msra.mxu1 %v3983_v60  ;;  %1804 = vmatprep.subr.bf16.mxu0 %v3988_v61  ;;  %v4073_v60 = vld [vmem:[#allocation5 + $0xc] ss:$16 sps:$4 sm:$0xff]  }
  0xa1   :  { %1845 = vmatprep.subr.bf16.mxu1 %v3991_v63  ;;  %v4076_v61 = vld [vmem:[#allocation5 + $0x20c] ss:$16 sps:$4 sm:$0xff]   ;;  %v4071_v63 = vld [vmem:[#allocation5 + $0x8] ss:$16 sps:$4 sm:$0xff]  }
  0xa3   :  { %1805 = vmatpush2.bf16.msra.mxu0 %v3986_v0  ;;  %v4074_v0 = vld [vmem:[#allocation5 + $0x208] ss:$16 sps:$4 sm:$0xff]  }
  0xa4   :  { %1846 = vmatpush2.bf16.msra.mxu1 %v3989_v1  ;;  %1806 = vmatprep.subr.bf16.mxu0 %v3994_v2  ;;  %v4079_v1 = vld [vmem:[#allocation5 + $0x1ec] ss:$16 sps:$4 sm:$0xff]  }
  0xa5   :  { %1847 = vmatprep.subr.bf16.mxu1 %v3997_v4  ;;  %v4082_v2 = vld [vmem:[#allocation5 + $0x3ec] ss:$16 sps:$4 sm:$0xff]   ;;  %v4077_v4 = vld [vmem:[#allocation5 + $0x1e8] ss:$16 sps:$4 sm:$0xff]  }
  0xa7   :  { %1807 = vmatpush2.bf16.msra.mxu0 %v3992_v5  ;;  %v4080_v5 = vld [vmem:[#allocation5 + $0x3e8] ss:$16 sps:$4 sm:$0xff]  }
  0xa8   :  { %1848 = vmatpush2.bf16.msra.mxu1 %v3995_v6  ;;  %1808 = vmatprep.subr.bf16.mxu0 %v4000_v7  ;;  %v4085_v6 = vld [vmem:[#allocation5 + $0x1cc] ss:$16 sps:$4 sm:$0xff]  }
  0xa9   :  { %1849 = vmatprep.subr.bf16.mxu1 %v4003_v8  ;;  %v4088_v7 = vld [vmem:[#allocation5 + $0x3cc] ss:$16 sps:$4 sm:$0xff]   ;;  %v4083_v8 = vld [vmem:[#allocation5 + $0x1c8] ss:$16 sps:$4 sm:$0xff]  }
  0xab   :  { %1809 = vmatpush2.bf16.msra.mxu0 %v3998_v9  ;;  %v4086_v9 = vld [vmem:[#allocation5 + $0x3c8] ss:$16 sps:$4 sm:$0xff]  }
  0xac   :  { %1850 = vmatpush2.bf16.msra.mxu1 %v4001_v10  ;;  %1810 = vmatprep.subr.bf16.mxu0 %v4006_v11  ;;  %v4091_v10 = vld [vmem:[#allocation5 + $0x1ac] ss:$16 sps:$4 sm:$0xff]  }
  0xad   :  { %1851 = vmatprep.subr.bf16.mxu1 %v4009_v12  ;;  %v4094_v11 = vld [vmem:[#allocation5 + $0x3ac] ss:$16 sps:$4 sm:$0xff]   ;;  %v4089_v12 = vld [vmem:[#allocation5 + $0x1a8] ss:$16 sps:$4 sm:$0xff]  }
  0xaf   :  { %1811 = vmatpush2.bf16.msra.mxu0 %v4004_v13  ;;  %v4092_v13 = vld [vmem:[#allocation5 + $0x3a8] ss:$16 sps:$4 sm:$0xff]  }
  0xb0   :  { %1852 = vmatpush2.bf16.msra.mxu1 %v4007_v14  ;;  %1812 = vmatprep.subr.bf16.mxu0 %v4012_v15  ;;  %v4097_v14 = vld [vmem:[#allocation5 + $0x18c] ss:$16 sps:$4 sm:$0xff]  }
  0xb1   :  { %1853 = vmatprep.subr.bf16.mxu1 %v4015_v18  ;;  %v4100_v15 = vld [vmem:[#allocation5 + $0x38c] ss:$16 sps:$4 sm:$0xff]   ;;  %v4095_v18 = vld [vmem:[#allocation5 + $0x188] ss:$16 sps:$4 sm:$0xff]  }
  0xb3   :  { %1813 = vmatpush2.bf16.msra.mxu0 %v4010_v19  ;;  %v4098_v19 = vld [vmem:[#allocation5 + $0x388] ss:$16 sps:$4 sm:$0xff]  }
  0xb4   :  { %1854 = vmatpush2.bf16.msra.mxu1 %v4013_v20  ;;  %1814 = vmatprep.subr.bf16.mxu0 %v4018_v21  ;;  %v4103_v20 = vld [vmem:[#allocation5 + $0x16c] ss:$16 sps:$4 sm:$0xff]  }
  0xb5   :  { %1855 = vmatprep.subr.bf16.mxu1 %v4021_v22  ;;  %v4106_v21 = vld [vmem:[#allocation5 + $0x36c] ss:$16 sps:$4 sm:$0xff]   ;;  %v4101_v22 = vld [vmem:[#allocation5 + $0x168] ss:$16 sps:$4 sm:$0xff]  }
  0xb7   :  { %1815 = vmatpush2.bf16.msra.mxu0 %v4016_v23  ;;  %v4104_v23 = vld [vmem:[#allocation5 + $0x368] ss:$16 sps:$4 sm:$0xff]  }
  0xb8   :  { %1856 = vmatpush2.bf16.msra.mxu1 %v4019_v24  ;;  %1816 = vmatprep.subr.bf16.mxu0 %v4024_v25  ;;  %v4109_v24 = vld [vmem:[#allocation5 + $0x14c] ss:$16 sps:$4 sm:$0xff]  }
  0xb9   :  { %1857 = vmatprep.subr.bf16.mxu1 %v4027_v26  ;;  %v4112_v25 = vld [vmem:[#allocation5 + $0x34c] ss:$16 sps:$4 sm:$0xff]   ;;  %v4107_v26 = vld [vmem:[#allocation5 + $0x148] ss:$16 sps:$4 sm:$0xff]  }
  0xbb   :  { %1817 = vmatpush2.bf16.msra.mxu0 %v4022_v27  ;;  %v4110_v27 = vld [vmem:[#allocation5 + $0x348] ss:$16 sps:$4 sm:$0xff]  }
  0xbc   :  { %1858 = vmatpush2.bf16.msra.mxu1 %v4025_v28  ;;  %1868 = vmatprep.subr.bf16.mxu0 %v4031_v29  ;;  %v4115_v28 = vld [vmem:[#allocation5 + $0x12c] ss:$16 sps:$4 sm:$0xff]  }
  0xbd   :  { %1909 = vmatprep.subr.bf16.mxu1 %v4034_v30  ;;  %v4118_v29 = vld [vmem:[#allocation5 + $0x32c] ss:$16 sps:$4 sm:$0xff]   ;;  %v4113_v30 = vld [vmem:[#allocation5 + $0x128] ss:$16 sps:$4 sm:$0xff]  }
  0xbe   :  { %1819 = vmatmul.mubr.bf16.vlgmr.msra.gmra.mxu0 %v4676_v31 }
  0xbf   :  { %1860 = vmatmul.mubr.bf16.vlgmr.msra.gmra.mxu1 %v4680_v32  ;;  %1869 = vmatpush1.bf16.msra.mxu0 %v4029_v33  ;;  %v4116_v33 = vld [vmem:[#allocation5 + $0x328] ss:$16 sps:$4 sm:$0xff]  }
  0xc0   :  { %1910 = vmatpush1.bf16.msra.mxu1 %v4032_v34  ;;  %1870 = vmatprep.subr.bf16.mxu0 %v4037_v35  ;;  %v4121_v34 = vld [vmem:[#allocation5 + $0x10c] ss:$16 sps:$4 sm:$0xff]  }
  0xc1   :  { %1911 = vmatprep.subr.bf16.mxu1 %v4040_v36  ;;  %1900 = vmatprep.mubr.bf16.mxu0 %v4646_v62  ;;  %v4053_v62 = vld [vmem:[#allocation5 + $0x68] ss:$16 sps:$4 sm:$0xff]   ;;  %v4124_v35 = vld [vmem:[#allocation5 + $0x30c] ss:$16 sps:$4 sm:$0xff]  }
  0xc2   :  { %1941 = vmatprep.mubr.bf16.mxu1 %v4648_v3  ;;  %v4056_v3 = vld [vmem:[#allocation5 + $0x268] ss:$16 sps:$4 sm:$0xff]  }
  0xc3   :  { %1871 = vmatpush1.bf16.msra.mxu0 %v4035_v37  ;;  %v4119_v36 = vld [vmem:[#allocation5 + $0x108] ss:$16 sps:$4 sm:$0xff]  }
  0xc4   :  { %1912 = vmatpush1.bf16.msra.mxu1 %v4038_v38  ;;  %1872 = vmatprep.subr.bf16.mxu0 %v4043_v39  ;;  %v4122_v37 = vld [vmem:[#allocation5 + $0x308] ss:$16 sps:$4 sm:$0xff]   ;;  %v4127_v38 = vld [vmem:[#allocation5 + $0x4ec] ss:$16 sps:$4 sm:$0xff]  }
  0xc5   :  { %1913 = vmatprep.subr.bf16.mxu1 %v4046_v40  ;;  %v4130_v39 = vld [vmem:[#allocation5 + $0x6ec] ss:$16 sps:$4 sm:$0xff]   ;;  %v4125_v40 = vld [vmem:[#allocation5 + $0x4e8] ss:$16 sps:$4 sm:$0xff]  }
  0xc7   :  { %1873 = vmatpush1.bf16.msra.mxu0 %v4041_v41  ;;  %v4128_v41 = vld [vmem:[#allocation5 + $0x6e8] ss:$16 sps:$4 sm:$0xff]  }
  0xc8   :  { %1914 = vmatpush1.bf16.msra.mxu1 %v4044_v42  ;;  %1874 = vmatprep.subr.bf16.mxu0 %v4049_v44  ;;  %v4133_v42 = vld [vmem:[#allocation5 + $0x4cc] ss:$16 sps:$4 sm:$0xff]  }
  0xc9   :  { %1915 = vmatprep.subr.bf16.mxu1 %v4052_v45  ;;  %v4136_v44 = vld [vmem:[#allocation5 + $0x6cc] ss:$16 sps:$4 sm:$0xff]   ;;  %v4131_v45 = vld [vmem:[#allocation5 + $0x4c8] ss:$16 sps:$4 sm:$0xff]  }
  0xcb   :  { %1875 = vmatpush1.bf16.msra.mxu0 %v4047_v46  ;;  %v4134_v46 = vld [vmem:[#allocation5 + $0x6c8] ss:$16 sps:$4 sm:$0xff]  }
  0xcc   :  { %1916 = vmatpush1.bf16.msra.mxu1 %v4050_v47  ;;  %1876 = vmatprep.subr.bf16.mxu0 %v4055_v48  ;;  %v4139_v47 = vld [vmem:[#allocation5 + $0x4ac] ss:$16 sps:$4 sm:$0xff]  }
  0xcd   :  { %1917 = vmatprep.subr.bf16.mxu1 %v4058_v50  ;;  %v4142_v48 = vld [vmem:[#allocation5 + $0x6ac] ss:$16 sps:$4 sm:$0xff]   ;;  %v4137_v50 = vld [vmem:[#allocation5 + $0x4a8] ss:$16 sps:$4 sm:$0xff]  }
  0xcf   :  { %1877 = vmatpush1.bf16.msra.mxu0 %v4053_v62  ;;  %v4140_v62 = vld [vmem:[#allocation5 + $0x6a8] ss:$16 sps:$4 sm:$0xff]  }
  0xd0   :  { %1918 = vmatpush1.bf16.msra.mxu1 %v4056_v3  ;;  %1878 = vmatprep.subr.bf16.mxu0 %v4061_v51  ;;  %v4145_v3 = vld [vmem:[#allocation5 + $0x48c] ss:$16 sps:$4 sm:$0xff]   ;;  %v4143_v51 = vld [vmem:[#allocation5 + $0x488] ss:$16 sps:$4 sm:$0xff]  }
  0xd1   :  { %1919 = vmatprep.subr.bf16.mxu1 %v4064_v52  ;;  %v4151_v52 = vld [vmem:[#allocation5 + $0x46c] ss:$16 sps:$4 sm:$0xff]  }
  0xd3   :  { %1879 = vmatpush1.bf16.msra.mxu0 %v4059_v54  ;;  %v4154_v54 = vld [vmem:[#allocation5 + $0x66c] ss:$16 sps:$4 sm:$0xff]  }
  0xd4   :  { %1920 = vmatpush1.bf16.msra.mxu1 %v4062_v55  ;;  %1880 = vmatprep.subr.bf16.mxu0 %v4067_v56  ;;  %v4149_v55 = vld [vmem:[#allocation5 + $0x468] ss:$16 sps:$4 sm:$0xff]  }
  0xd5   :  { %1921 = vmatprep.subr.bf16.mxu1 %v4070_v58  ;;  %v4152_v56 = vld [vmem:[#allocation5 + $0x668] ss:$16 sps:$4 sm:$0xff]  }
  0xd6   :  { %v4155_v58 = vld [vmem:[#allocation5 + $0x448] ss:$16 sps:$4 sm:$0xff]  }
  0xd7   :  { %1881 = vmatpush1.bf16.msra.mxu0 %v4065_v49  ;;  %v4158_v49 = vld [vmem:[#allocation5 + $0x648] ss:$16 sps:$4 sm:$0xff]  }
  0xd8   :  { %1922 = vmatpush1.bf16.msra.mxu1 %v4068_v59  ;;  %1882 = vmatprep.subr.bf16.mxu0 %v4073_v60  ;;  %v4163_v59 = vld [vmem:[#allocation5 + $0x42c] ss:$16 sps:$4 sm:$0xff]  }
  0xd9   :  { %1923 = vmatprep.subr.bf16.mxu1 %v4076_v61  ;;  %v4166_v60 = vld [vmem:[#allocation5 + $0x62c] ss:$16 sps:$4 sm:$0xff]   ;;  %v4161_v61 = vld [vmem:[#allocation5 + $0x428] ss:$16 sps:$4 sm:$0xff]  }
  0xdb   :  { %1883 = vmatpush1.bf16.msra.mxu0 %v4071_v63  ;;  %v4164_v63 = vld [vmem:[#allocation5 + $0x628] ss:$16 sps:$4 sm:$0xff]  }
  0xdc   :  { %1924 = vmatpush1.bf16.msra.mxu1 %v4074_v0  ;;  %1884 = vmatprep.subr.bf16.mxu0 %v4079_v1  ;;  %v4169_v0 = vld [vmem:[#allocation5 + $0x40c] ss:$16 sps:$4 sm:$0xff]  }
  0xdd   :  { %1925 = vmatprep.subr.bf16.mxu1 %v4082_v2  ;;  %v4172_v1 = vld [vmem:[#allocation5 + $0x60c] ss:$16 sps:$4 sm:$0xff]   ;;  %v4167_v2 = vld [vmem:[#allocation5 + $0x408] ss:$16 sps:$4 sm:$0xff]  }
  0xdf   :  { %1885 = vmatpush2.bf16.msra.mxu0 %v4077_v4  ;;  %v4170_v4 = vld [vmem:[#allocation5 + $0x608] ss:$16 sps:$4 sm:$0xff]  }
  0xe0   :  { %1926 = vmatpush2.bf16.msra.mxu1 %v4080_v5  ;;  %1886 = vmatprep.subr.bf16.mxu0 %v4085_v6  ;;  %v4175_v5 = vld [vmem:[#allocation5 + $0x5ec] ss:$16 sps:$4 sm:$0xff]  }
  0xe1   :  { %1927 = vmatprep.subr.bf16.mxu1 %v4088_v7  ;;  %v4178_v6 = vld [vmem:[#allocation5 + $0x7ec] ss:$16 sps:$4 sm:$0xff]   ;;  %v4173_v7 = vld [vmem:[#allocation5 + $0x5e8] ss:$16 sps:$4 sm:$0xff]  }
  0xe3   :  { %1887 = vmatpush2.bf16.msra.mxu0 %v4083_v8  ;;  %v4176_v8 = vld [vmem:[#allocation5 + $0x7e8] ss:$16 sps:$4 sm:$0xff]  }
  0xe4   :  { %1928 = vmatpush2.bf16.msra.mxu1 %v4086_v9  ;;  %1888 = vmatprep.subr.bf16.mxu0 %v4091_v10  ;;  %v4181_v9 = vld [vmem:[#allocation5 + $0x5cc] ss:$16 sps:$4 sm:$0xff]  }
  0xe5   :  { %1929 = vmatprep.subr.bf16.mxu1 %v4094_v11  ;;  %v4184_v10 = vld [vmem:[#allocation5 + $0x7cc] ss:$16 sps:$4 sm:$0xff]   ;;  %v4179_v11 = vld [vmem:[#allocation5 + $0x5c8] ss:$16 sps:$4 sm:$0xff]  }
  0xe7   :  { %1889 = vmatpush2.bf16.msra.mxu0 %v4089_v12  ;;  %v4182_v12 = vld [vmem:[#allocation5 + $0x7c8] ss:$16 sps:$4 sm:$0xff]  }
  0xe8   :  { %1930 = vmatpush2.bf16.msra.mxu1 %v4092_v13  ;;  %1890 = vmatprep.subr.bf16.mxu0 %v4097_v14  ;;  %v4187_v13 = vld [vmem:[#allocation5 + $0x5ac] ss:$16 sps:$4 sm:$0xff]  }
  0xe9   :  { %1931 = vmatprep.subr.bf16.mxu1 %v4100_v15  ;;  %v4190_v14 = vld [vmem:[#allocation5 + $0x7ac] ss:$16 sps:$4 sm:$0xff]   ;;  %v4185_v15 = vld [vmem:[#allocation5 + $0x5a8] ss:$16 sps:$4 sm:$0xff]  }
  0xeb   :  { %1891 = vmatpush2.bf16.msra.mxu0 %v4095_v18  ;;  %v4188_v18 = vld [vmem:[#allocation5 + $0x7a8] ss:$16 sps:$4 sm:$0xff]  }
  0xec   :  { %1932 = vmatpush2.bf16.msra.mxu1 %v4098_v19  ;;  %1892 = vmatprep.subr.bf16.mxu0 %v4103_v20  ;;  %v4193_v19 = vld [vmem:[#allocation5 + $0x58c] ss:$16 sps:$4 sm:$0xff]  }
  0xed   :  { %1933 = vmatprep.subr.bf16.mxu1 %v4106_v21  ;;  %v4196_v20 = vld [vmem:[#allocation5 + $0x78c] ss:$16 sps:$4 sm:$0xff]   ;;  %v4191_v21 = vld [vmem:[#allocation5 + $0x588] ss:$16 sps:$4 sm:$0xff]  }
  0xef   :  { %1893 = vmatpush2.bf16.msra.mxu0 %v4101_v22  ;;  %v4194_v22 = vld [vmem:[#allocation5 + $0x788] ss:$16 sps:$4 sm:$0xff]  }
  0xf0   :  { %1934 = vmatpush2.bf16.msra.mxu1 %v4104_v23  ;;  %1894 = vmatprep.subr.bf16.mxu0 %v4109_v24  ;;  %v4199_v23 = vld [vmem:[#allocation5 + $0x56c] ss:$16 sps:$4 sm:$0xff]  }
  0xf1   :  { %1935 = vmatprep.subr.bf16.mxu1 %v4112_v25  ;;  %v4202_v24 = vld [vmem:[#allocation5 + $0x76c] ss:$16 sps:$4 sm:$0xff]   ;;  %v4197_v25 = vld [vmem:[#allocation5 + $0x568] ss:$16 sps:$4 sm:$0xff]  }
  0xf3   :  { %1895 = vmatpush2.bf16.msra.mxu0 %v4107_v26  ;;  %v4200_v26 = vld [vmem:[#allocation5 + $0x768] ss:$16 sps:$4 sm:$0xff]  }
  0xf4   :  { %1936 = vmatpush2.bf16.msra.mxu1 %v4110_v27  ;;  %1896 = vmatprep.subr.bf16.mxu0 %v4115_v28  ;;  %v4205_v27 = vld [vmem:[#allocation5 + $0x54c] ss:$16 sps:$4 sm:$0xff]  }
  0xf5   :  { %1937 = vmatprep.subr.bf16.mxu1 %v4118_v29  ;;  %v4208_v28 = vld [vmem:[#allocation5 + $0x74c] ss:$16 sps:$4 sm:$0xff]   ;;  %v4203_v29 = vld [vmem:[#allocation5 + $0x548] ss:$16 sps:$4 sm:$0xff]  }
  0xf7   :  { %1897 = vmatpush2.bf16.msra.mxu0 %v4113_v30  ;;  %v4206_v30 = vld [vmem:[#allocation5 + $0x748] ss:$16 sps:$4 sm:$0xff]  }
  0xf8   :  { %1938 = vmatpush2.bf16.msra.mxu1 %v4116_v33  ;;  %1898 = vmatprep.subr.bf16.mxu0 %v4121_v34  ;;  %v4211_v33 = vld [vmem:[#allocation5 + $0x52c] ss:$16 sps:$4 sm:$0xff]  }
  0xf9   :  { %1939 = vmatprep.subr.bf16.mxu1 %v4124_v35  ;;  %v4214_v34 = vld [vmem:[#allocation5 + $0x72c] ss:$16 sps:$4 sm:$0xff]   ;;  %v4209_v35 = vld [vmem:[#allocation5 + $0x528] ss:$16 sps:$4 sm:$0xff]  }
  0xfb   :  { %1899 = vmatpush2.bf16.msra.mxu0 %v4119_v36  ;;  %v4212_v36 = vld [vmem:[#allocation5 + $0x728] ss:$16 sps:$4 sm:$0xff]  }
  0xfc   :  { %1940 = vmatpush2.bf16.msra.mxu1 %v4122_v37  ;;  %1950 = vmatprep.subr.bf16.mxu0 %v4127_v38  ;;  %v4217_v37 = vld [vmem:[#allocation5 + $0x50c] ss:$16 sps:$4 sm:$0xff]  }
  0xfd   :  { %1991 = vmatprep.subr.bf16.mxu1 %v4130_v39  ;;  %v4220_v38 = vld [vmem:[#allocation5 + $0x70c] ss:$16 sps:$4 sm:$0xff]   ;;  %v4215_v39 = vld [vmem:[#allocation5 + $0x508] ss:$16 sps:$4 sm:$0xff]  }
  0xfe   :  { %1901 = vmatmul.mubr.bf16.vlgmr.msra.gmra.mxu0 %v4652_v16  ;;  %v4148_v16 = vld [vmem:[#allocation5 + $0x68c] ss:$16 sps:$4 sm:$0xff]  }
  0xff   :  { %1942 = vmatmul.mubr.bf16.vlgmr.msra.gmra.mxu1 %v4654_v17  ;;  %1951 = vmatpush1.bf16.msra.mxu0 %v4125_v40  ;;  %v4146_v17 = vld [vmem:[#allocation5 + $0x688] ss:$16 sps:$4 sm:$0xff]  }
 0x100   :  { %1992 = vmatpush1.bf16.msra.mxu1 %v4128_v41  ;;  %1952 = vmatprep.subr.bf16.mxu0 %v4133_v42  ;;  %v4218_v40 = vld [vmem:[#allocation5 + $0x708] ss:$16 sps:$4 sm:$0xff]   ;;  %v4221_v42 = vld [vmem:[#allocation8 + $0xe0] ss:$16 sps:$4 sm:$0xff]  }
 0x101   :  { %1993 = vmatprep.subr.bf16.mxu1 %v4136_v44  ;;  %1982 = vmatprep.mubr.bf16.mxu0 %v4666_v53  ;;  %v4157_v53 = vld [vmem:[#allocation5 + $0x44c] ss:$16 sps:$4 sm:$0xff]   ;;  %v4223_v41 = vld [vmem:[#allocation8 + $0xe4] ss:$16 sps:$4 sm:$0xff]  }
 0x102   :  { %2023 = vmatprep.mubr.bf16.mxu1 %v4670_v57  ;;  %v4160_v57 = vld [vmem:[#allocation5 + $0x64c] ss:$16 sps:$4 sm:$0xff]   ;;  %v4226_v44 = vld [vmem:[#allocation8 + $0xc4] ss:$16 sps:$4 sm:$0xff]  }
 0x103   :  { %1953 = vmatpush1.bf16.msra.mxu0 %v4131_v45 }
 0x104   :  { %1994 = vmatpush1.bf16.msra.mxu1 %v4134_v46  ;;  %1954 = vmatprep.subr.bf16.mxu0 %v4139_v47  ;;  %v4224_v47 = vld [vmem:[#allocation8 + $0xc0] ss:$16 sps:$4 sm:$0xff]  }
 0x105   :  { %1995 = vmatprep.subr.bf16.mxu1 %v4142_v48 }
 0x107   :  { %1955 = vmatpush1.bf16.msra.mxu0 %v4137_v50 }
 0x108   :  { %1996 = vmatpush1.bf16.msra.mxu1 %v4140_v62  ;;  %1956 = vmatprep.subr.bf16.mxu0 %v4145_v3  ;;  %v4229_v62 = vld [vmem:[#allocation8 + $0xa4] ss:$16 sps:$4 sm:$0xff]  }
 0x109   :  { %1997 = vmatprep.subr.bf16.mxu1 %v4148_v16 }
 0x10b   :  { %1957 = vmatpush1.bf16.msra.mxu0 %v4143_v51  ;;  %v4227_v51 = vld [vmem:[#allocation8 + $0xa0] ss:$16 sps:$4 sm:$0xff]  }
 0x10c   :  { %1998 = vmatpush1.bf16.msra.mxu1 %v4146_v17  ;;  %1958 = vmatprep.subr.bf16.mxu0 %v4151_v52 }
 0x10d   :  { %1999 = vmatprep.subr.bf16.mxu1 %v4154_v54  ;;  %v4232_v54 = vld [vmem:[#allocation8 + $0x84] ss:$16 sps:$4 sm:$0xff]  }
 0x10f   :  { %1959 = vmatpush1.bf16.msra.mxu0 %v4149_v55  ;;  %v4317_v55 = vld [vmem:[#allocation8 + $0x2e0] ss:$16 sps:$4 sm:$0xff]  }
 0x110   :  { %2000 = vmatpush1.bf16.msra.mxu1 %v4152_v56  ;;  %1960 = vmatprep.subr.bf16.mxu0 %v4157_v53  ;;  %v4235_v56 = vld [vmem:[#allocation8 + $0x64] ss:$16 sps:$4 sm:$0xff]   ;;  %v4320_v53 = vld [vmem:[#allocation8 + $0x2c0] ss:$16 sps:$4 sm:$0xff]  }
 0x111   :  { %2001 = vmatprep.subr.bf16.mxu1 %v4160_v57  ;;  %v4322_v57 = vld [vmem:[#allocation8 + $0x2c4] ss:$16 sps:$4 sm:$0xff]  }
 0x113   :  { %1961 = vmatpush1.bf16.msra.mxu0 %v4155_v58  ;;  %v4233_v58 = vld [vmem:[#allocation8 + $0x60] ss:$16 sps:$4 sm:$0xff]  }
 0x114   :  { %2002 = vmatpush1.bf16.msra.mxu1 %v4158_v49  ;;  %1962 = vmatprep.subr.bf16.mxu0 %v4163_v59  ;;  %v4325_v49 = vld [vmem:[#allocation8 + $0x2a4] ss:$16 sps:$4 sm:$0xff]  }
 0x115   :  { %2003 = vmatprep.subr.bf16.mxu1 %v4166_v60  ;;  %v4238_v59 = vld [vmem:[#allocation8 + $0x44] ss:$16 sps:$4 sm:$0xff]   ;;  %v4323_v60 = vld [vmem:[#allocation8 + $0x2a0] ss:$16 sps:$4 sm:$0xff]  }
 0x117   :  { %1963 = vmatpush1.bf16.msra.mxu0 %v4161_v61  ;;  %v4236_v61 = vld [vmem:[#allocation8 + $0x40] ss:$16 sps:$4 sm:$0xff]  }
 0x118   :  { %2004 = vmatpush1.bf16.msra.mxu1 %v4164_v63  ;;  %1964 = vmatprep.subr.bf16.mxu0 %v4169_v0  ;;  %v4328_v63 = vld [vmem:[#allocation8 + $0x284] ss:$16 sps:$4 sm:$0xff]  }
 0x119   :  { %2005 = vmatprep.subr.bf16.mxu1 %v4172_v1  ;;  %v4241_v0 = vld [vmem:[#allocation8 + $0x24] ss:$16 sps:$4 sm:$0xff]   ;;  %v4326_v1 = vld [vmem:[#allocation8 + $0x280] ss:$16 sps:$4 sm:$0xff]  }
 0x11b   :  { %1965 = vmatpush1.bf16.msra.mxu0 %v4167_v2  ;;  %v4239_v2 = vld [vmem:[#allocation8 + $0x20] ss:$16 sps:$4 sm:$0xff]  }
 0x11c   :  { %2006 = vmatpush1.bf16.msra.mxu1 %v4170_v4  ;;  %1966 = vmatprep.subr.bf16.mxu0 %v4175_v5  ;;  %v4331_v4 = vld [vmem:[#allocation8 + $0x264] ss:$16 sps:$4 sm:$0xff]  }
 0x11d   :  { %2007 = vmatprep.subr.bf16.mxu1 %v4178_v6  ;;  %v4244_v5 = vld [vmem:[#allocation8 + $0x4] ss:$16 sps:$4 sm:$0xff]   ;;  %v4329_v6 = vld [vmem:[#allocation8 + $0x260] ss:$16 sps:$4 sm:$0xff]  }
 0x11f   :  { %1967 = vmatpush2.bf16.msra.mxu0 %v4173_v7  ;;  %v4242_v7 = vld [vmem:[#allocation8] ss:$16 sps:$4 sm:$0xff]  }
 0x120   :  { %2008 = vmatpush2.bf16.msra.mxu1 %v4176_v8  ;;  %1968 = vmatprep.subr.bf16.mxu0 %v4181_v9  ;;  %v4334_v8 = vld [vmem:[#allocation8 + $0x244] ss:$16 sps:$4 sm:$0xff]  }
 0x121   :  { %2009 = vmatprep.subr.bf16.mxu1 %v4184_v10  ;;  %v4247_v9 = vld [vmem:[#allocation8 + $0x1e4] ss:$16 sps:$4 sm:$0xff]   ;;  %v4332_v10 = vld [vmem:[#allocation8 + $0x240] ss:$16 sps:$4 sm:$0xff]  }
 0x123   :  { %1969 = vmatpush2.bf16.msra.mxu0 %v4179_v11  ;;  %v4245_v11 = vld [vmem:[#allocation8 + $0x1e0] ss:$16 sps:$4 sm:$0xff]  }
 0x124   :  { %2010 = vmatpush2.bf16.msra.mxu1 %v4182_v12  ;;  %1970 = vmatprep.subr.bf16.mxu0 %v4187_v13  ;;  %v4337_v12 = vld [vmem:[#allocation8 + $0x224] ss:$16 sps:$4 sm:$0xff]  }
 0x125   :  { %2011 = vmatprep.subr.bf16.mxu1 %v4190_v14  ;;  %v4250_v13 = vld [vmem:[#allocation8 + $0x1c4] ss:$16 sps:$4 sm:$0xff]   ;;  %v4335_v14 = vld [vmem:[#allocation8 + $0x220] ss:$16 sps:$4 sm:$0xff]  }
 0x127   :  { %1971 = vmatpush2.bf16.msra.mxu0 %v4185_v15  ;;  %v4248_v15 = vld [vmem:[#allocation8 + $0x1c0] ss:$16 sps:$4 sm:$0xff]  }
 0x128   :  { %2012 = vmatpush2.bf16.msra.mxu1 %v4188_v18  ;;  %1972 = vmatprep.subr.bf16.mxu0 %v4193_v19  ;;  %v4340_v18 = vld [vmem:[#allocation8 + $0x204] ss:$16 sps:$4 sm:$0xff]  }
 0x129   :  { %2013 = vmatprep.subr.bf16.mxu1 %v4196_v20  ;;  %v4253_v19 = vld [vmem:[#allocation8 + $0x1a4] ss:$16 sps:$4 sm:$0xff]   ;;  %v4338_v20 = vld [vmem:[#allocation8 + $0x200] ss:$16 sps:$4 sm:$0xff]  }
 0x12b   :  { %1973 = vmatpush2.bf16.msra.mxu0 %v4191_v21  ;;  %v4251_v21 = vld [vmem:[#allocation8 + $0x1a0] ss:$16 sps:$4 sm:$0xff]  }
 0x12c   :  { %2014 = vmatpush2.bf16.msra.mxu1 %v4194_v22  ;;  %1974 = vmatprep.subr.bf16.mxu0 %v4199_v23  ;;  %v4343_v22 = vld [vmem:[#allocation8 + $0x3e4] ss:$16 sps:$4 sm:$0xff]  }
 0x12d   :  { %2015 = vmatprep.subr.bf16.mxu1 %v4202_v24  ;;  %v4256_v23 = vld [vmem:[#allocation8 + $0x184] ss:$16 sps:$4 sm:$0xff]   ;;  %v4341_v24 = vld [vmem:[#allocation8 + $0x3e0] ss:$16 sps:$4 sm:$0xff]  }
 0x12f   :  { %1975 = vmatpush2.bf16.msra.mxu0 %v4197_v25  ;;  %v4254_v25 = vld [vmem:[#allocation8 + $0x180] ss:$16 sps:$4 sm:$0xff]  }
 0x130   :  { %2016 = vmatpush2.bf16.msra.mxu1 %v4200_v26  ;;  %1976 = vmatprep.subr.bf16.mxu0 %v4205_v27  ;;  %v4346_v26 = vld [vmem:[#allocation8 + $0x3c4] ss:$16 sps:$4 sm:$0xff]  }
 0x131   :  { %2017 = vmatprep.subr.bf16.mxu1 %v4208_v28  ;;  %v4259_v27 = vld [vmem:[#allocation8 + $0x164] ss:$16 sps:$4 sm:$0xff]   ;;  %v4344_v28 = vld [vmem:[#allocation8 + $0x3c0] ss:$16 sps:$4 sm:$0xff]  }
 0x133   :  { %1977 = vmatpush2.bf16.msra.mxu0 %v4203_v29  ;;  %v4257_v29 = vld [vmem:[#allocation8 + $0x160] ss:$16 sps:$4 sm:$0xff]  }
 0x134   :  { %2018 = vmatpush2.bf16.msra.mxu1 %v4206_v30  ;;  %1978 = vmatprep.subr.bf16.mxu0 %v4211_v33  ;;  %v4349_v30 = vld [vmem:[#allocation8 + $0x3a4] ss:$16 sps:$4 sm:$0xff]  }
 0x135   :  { %2019 = vmatprep.subr.bf16.mxu1 %v4214_v34  ;;  %v4262_v33 = vld [vmem:[#allocation8 + $0x144] ss:$16 sps:$4 sm:$0xff]   ;;  %v4347_v34 = vld [vmem:[#allocation8 + $0x3a0] ss:$16 sps:$4 sm:$0xff]  }
 0x137   :  { %1979 = vmatpush2.bf16.msra.mxu0 %v4209_v35  ;;  %v4260_v35 = vld [vmem:[#allocation8 + $0x140] ss:$16 sps:$4 sm:$0xff]  }
 0x138   :  { %2020 = vmatpush2.bf16.msra.mxu1 %v4212_v36  ;;  %1980 = vmatprep.subr.bf16.mxu0 %v4217_v37  ;;  %v4352_v36 = vld [vmem:[#allocation8 + $0x384] ss:$16 sps:$4 sm:$0xff]  }
 0x139   :  { %2021 = vmatprep.subr.bf16.mxu1 %v4220_v38  ;;  %v4265_v37 = vld [vmem:[#allocation8 + $0x124] ss:$16 sps:$4 sm:$0xff]   ;;  %v406_v38 = vsub.s32 0, %v4639_v43 }
 0x13b   :  { %1981 = vmatpush2.bf16.msra.mxu0 %v4215_v39  ;;  %v4701_v39 = vld [vmem:[#allocation7] sm:$0xf] }
 0x13c   :  { %2022 = vmatpush2.bf16.msra.mxu1 %v4218_v40  ;;  %2830 = vmatprep.subr.bf16.mxu0 %v4223_v41  ;;  %v4350_v40 = vld [vmem:[#allocation8 + $0x380] ss:$16 sps:$4 sm:$0xff]   ;;  %v410_v41 = vsub.s32 1, %v4639_v43 }
 0x13e   :  { %v4690_v45 = vpop.f32.mrf.mxu0  ;;  %1983 = vmatmul.mubr.bf16.vlgmr.msra.gmra.mxu0 %v4676_v31  ;;  %v4230_v31 = vld [vmem:[#allocation8 + $0x80] ss:$16 sps:$4 sm:$0xff]  }
 0x13f   :  { %v4692_v46 = vpop.f32.mrf.mxu1  ;;  %2024 = vmatmul.mubr.bf16.vlgmr.msra.gmra.mxu1 %v4680_v32  ;;  %2831 = vmatpush1.bf16.msra.mxu0 %v4221_v42  ;;  %v4319_v32 = vld [vmem:[#allocation8 + $0x2e4] ss:$16 sps:$4 sm:$0xff]   ;;  %v4263_v42 = vld [vmem:[#allocation8 + $0x120] ss:$16 sps:$4 sm:$0xff]  }
 0x140   :  { %v4696_v48 = vpop.f32.mrf.mxu0  ;;  %2832 = vmatprep.subr.bf16.mxu0 %v4226_v44  ;;  %2871 = vmatprep.subr.bf16.mxu1 %v4319_v32  ;;  %v4355_v44 = vld [vmem:[#allocation8 + $0x364] ss:$16 sps:$4 sm:$0xff]  }
 0x141   :  { %v4698_v50 = vpop.f32.mrf.mxu1  ;;  %2872 = vmatpush1.bf16.msra.mxu1 %v4317_v55 }
 0x142   :  { %v1742_v3 = vpop.f32.mrf.mxu0  ;;  %2873 = vmatprep.subr.bf16.mxu1 %v4322_v57 }
 0x143   :  { %v1783_v16 = vpop.f32.mrf.mxu1  ;;  %2833 = vmatpush1.bf16.msra.mxu0 %v4224_v47  ;;  %v4268_v47 = vld [vmem:[#allocation8 + $0x104] ss:$16 sps:$4 sm:$0xff]   ;;  %v4353_v3 = vld [vmem:[#allocation8 + $0x360] ss:$16 sps:$4 sm:$0xff]  }
 0x144   :  { %v1743_v17 = vpop.f32.mrf.mxu0  ;;  %2834 = vmatprep.subr.bf16.mxu0 %v4229_v62  ;;  %v407_v62 = vrot.slane %v4701_v39, %v406_v38  ;;  %v411_v16 = vrot.slane %v4701_v39, %v410_v41 }
 0x145   :  { %v1784_v52 = vpop.f32.mrf.mxu1  ;;  %2874 = vmatpush1.bf16.msra.mxu1 %v4320_v53  ;;  %v4358_v17 = vld [vmem:[#allocation8 + $0x344] ss:$16 sps:$4 sm:$0xff]  }
 0x146   :  { %2875 = vmatprep.subr.bf16.mxu1 %v4325_v49  ;;  %v4271_v52 = vld [vmem:[#allocation8 + $0xec] ss:$16 sps:$4 sm:$0xff]   ;;  %v1741_v55 = vadd.f32 %v4696_v48, %v411_v16  ;;  %v4311_v16 = vld [vmem:[#allocation8 + $0x128] ss:$16 sps:$4 sm:$0xff]  }
 0x147   :  { %2835 = vmatpush1.bf16.msra.mxu0 %v4227_v51  ;;  %v4266_v51 = vld [vmem:[#allocation8 + $0x100] ss:$16 sps:$4 sm:$0xff]  }
 0x148   :  { %2836 = vmatprep.subr.bf16.mxu0 %v4232_v54  ;;  %v1739_v54 = vadd.f32 %v4690_v45, %v407_v62  ;;  %v1782_v57 = vadd.f32 %v4698_v50, %v1741_v55  ;;  %v4314_v55 = vld [vmem:[#allocation8 + $0x108] ss:$16 sps:$4 sm:$0xff]  }
 0x149   :  { %2876 = vmatpush1.bf16.msra.mxu1 %v4323_v60  ;;  %v4361_v60 = vld [vmem:[#allocation8 + $0x324] ss:$16 sps:$4 sm:$0xff]  }
 0x14a   :  { %2877 = vmatprep.subr.bf16.mxu1 %v4328_v63  ;;  %v1780_v32 = vadd.f32 %v4692_v46, %v1739_v54  ;;  %v4359_v63 = vld [vmem:[#allocation8 + $0x320] ss:$16 sps:$4 sm:$0xff]  }
 0x14b   :  { %2837 = vmatpush1.bf16.msra.mxu0 %v4230_v31  ;;  %v4356_v31 = vld [vmem:[#allocation8 + $0x340] ss:$16 sps:$4 sm:$0xff]  }
 0x14c   :  { %2838 = vmatprep.subr.bf16.mxu0 %v4235_v56 }
 0x14d   :  { %2878 = vmatpush1.bf16.msra.mxu1 %v4326_v1 }
 0x14e   :  { %2879 = vmatprep.subr.bf16.mxu1 %v4331_v4 }
 0x14f   :  { %2839 = vmatpush1.bf16.msra.mxu0 %v4233_v58 }
 0x150   :  { %2840 = vmatprep.subr.bf16.mxu0 %v4238_v59 }
 0x151   :  { %2880 = vmatpush1.bf16.msra.mxu1 %v4329_v6 }
 0x152   :  { %2881 = vmatprep.subr.bf16.mxu1 %v4334_v8  ;;  %v4269_v8 = vld [vmem:[#allocation8 + $0xe8] ss:$16 sps:$4 sm:$0xff]  }
 0x153   :  { %2841 = vmatpush1.bf16.msra.mxu0 %v4236_v61 }
 0x154   :  { %2842 = vmatprep.subr.bf16.mxu0 %v4241_v0 }
 0x155   :  { %2882 = vmatpush1.bf16.msra.mxu1 %v4332_v10  ;;  %v4274_v10 = vld [vmem:[#allocation8 + $0xcc] ss:$16 sps:$4 sm:$0xff]  }
 0x156   :  { %2883 = vmatprep.subr.bf16.mxu1 %v4337_v12  ;;  %v4272_v12 = vld [vmem:[#allocation8 + $0xc8] ss:$16 sps:$4 sm:$0xff]  }
 0x157   :  { %2843 = vmatpush1.bf16.msra.mxu0 %v4239_v2 }
 0x158   :  { %2844 = vmatprep.subr.bf16.mxu0 %v4244_v5  ;;  %v4364_v5 = vld [vmem:[#allocation8 + $0x304] ss:$16 sps:$4 sm:$0xff]  }
 0x159   :  { %2884 = vmatpush1.bf16.msra.mxu1 %v4335_v14  ;;  %v4275_v14 = vld [vmem:[#allocation8 + $0xa8] ss:$16 sps:$4 sm:$0xff]  }
 0x15a   :  { %2885 = vmatprep.subr.bf16.mxu1 %v4340_v18  ;;  %v4278_v18 = vld [vmem:[#allocation8 + $0x88] ss:$16 sps:$4 sm:$0xff]  }
 0x15b   :  { %2845 = vmatpush1.bf16.msra.mxu0 %v4242_v7  ;;  %v4362_v7 = vld [vmem:[#allocation8 + $0x300] ss:$16 sps:$4 sm:$0xff]  }
 0x15c   :  { %2846 = vmatprep.subr.bf16.mxu0 %v4247_v9 }
 0x15d   :  { %2886 = vmatpush1.bf16.msra.mxu1 %v4338_v20  ;;  %v4281_v20 = vld [vmem:[#allocation8 + $0x68] ss:$16 sps:$4 sm:$0xff]  }
 0x15e   :  { %2887 = vmatprep.subr.bf16.mxu1 %v4343_v22  ;;  %v4284_v22 = vld [vmem:[#allocation8 + $0x48] ss:$16 sps:$4 sm:$0xff]  }
 0x15f   :  { %2847 = vmatpush2.bf16.msra.mxu0 %v4245_v11  ;;  %v4367_v11 = vld [vmem:[#allocation8 + $0x2ec] ss:$16 sps:$4 sm:$0xff]  }
 0x160   :  { %2848 = vmatprep.subr.bf16.mxu0 %v4250_v13  ;;  %v4277_v13 = vld [vmem:[#allocation8 + $0xac] ss:$16 sps:$4 sm:$0xff]  }
 0x161   :  { %2888 = vmatpush2.bf16.msra.mxu1 %v4341_v24  ;;  %v4287_v24 = vld [vmem:[#allocation8 + $0x28] ss:$16 sps:$4 sm:$0xff]  }
 0x162   :  { %2889 = vmatprep.subr.bf16.mxu1 %v4346_v26  ;;  %v4290_v26 = vld [vmem:[#allocation8 + $0x8] ss:$16 sps:$4 sm:$0xff]  }
 0x163   :  { %2849 = vmatpush2.bf16.msra.mxu0 %v4248_v15  ;;  %v4280_v15 = vld [vmem:[#allocation8 + $0x8c] ss:$16 sps:$4 sm:$0xff]  }
 0x164   :  { %2850 = vmatprep.subr.bf16.mxu0 %v4253_v19  ;;  %v4283_v19 = vld [vmem:[#allocation8 + $0x6c] ss:$16 sps:$4 sm:$0xff]  }
 0x165   :  { %2890 = vmatpush2.bf16.msra.mxu1 %v4344_v28  ;;  %v4293_v28 = vld [vmem:[#allocation8 + $0x1e8] ss:$16 sps:$4 sm:$0xff]  }
 0x166   :  { %2891 = vmatprep.subr.bf16.mxu1 %v4349_v30  ;;  %v4296_v30 = vld [vmem:[#allocation8 + $0x1c8] ss:$16 sps:$4 sm:$0xff]  }
 0x167   :  { %2851 = vmatpush2.bf16.msra.mxu0 %v4251_v21  ;;  %v4286_v21 = vld [vmem:[#allocation8 + $0x4c] ss:$16 sps:$4 sm:$0xff]  }
 0x168   :  { %2852 = vmatprep.subr.bf16.mxu0 %v4256_v23  ;;  %v4289_v23 = vld [vmem:[#allocation8 + $0x2c] ss:$16 sps:$4 sm:$0xff]  }
 0x169   :  { %2892 = vmatpush2.bf16.msra.mxu1 %v4347_v34  ;;  %v4299_v34 = vld [vmem:[#allocation8 + $0x1a8] ss:$16 sps:$4 sm:$0xff]  }
 0x16a   :  { %2893 = vmatprep.subr.bf16.mxu1 %v4352_v36  ;;  %v4302_v36 = vld [vmem:[#allocation8 + $0x188] ss:$16 sps:$4 sm:$0xff]  }
 0x16b   :  { %2853 = vmatpush2.bf16.msra.mxu0 %v4254_v25  ;;  %v4292_v25 = vld [vmem:[#allocation8 + $0xc] ss:$16 sps:$4 sm:$0xff]  }
 0x16c   :  { %2854 = vmatprep.subr.bf16.mxu0 %v4259_v27  ;;  %v4295_v27 = vld [vmem:[#allocation8 + $0x1ec] ss:$16 sps:$4 sm:$0xff]  }
 0x16d   :  { %2894 = vmatpush2.bf16.msra.mxu1 %v4350_v40  ;;  %v4305_v40 = vld [vmem:[#allocation8 + $0x168] ss:$16 sps:$4 sm:$0xff]  }
 0x16e   :  { %2895 = vmatprep.subr.bf16.mxu1 %v4355_v44  ;;  %v4308_v44 = vld [vmem:[#allocation8 + $0x148] ss:$16 sps:$4 sm:$0xff]  }
 0x16f   :  { %2855 = vmatpush2.bf16.msra.mxu0 %v4257_v29  ;;  %v4298_v29 = vld [vmem:[#allocation8 + $0x1cc] ss:$16 sps:$4 sm:$0xff]  }
 0x170   :  { %2856 = vmatprep.subr.bf16.mxu0 %v4262_v33  ;;  %v4301_v33 = vld [vmem:[#allocation8 + $0x1ac] ss:$16 sps:$4 sm:$0xff]  }
 0x171   :  { %2896 = vmatpush2.bf16.msra.mxu1 %v4353_v3 }
 0x172   :  { %2897 = vmatprep.subr.bf16.mxu1 %v4358_v17 }
 0x173   :  { %2857 = vmatpush2.bf16.msra.mxu0 %v4260_v35  ;;  %v4304_v35 = vld [vmem:[#allocation8 + $0x18c] ss:$16 sps:$4 sm:$0xff]  }
 0x174   :  { %2858 = vmatprep.subr.bf16.mxu0 %v4265_v37  ;;  %v4307_v37 = vld [vmem:[#allocation8 + $0x16c] ss:$16 sps:$4 sm:$0xff]  }
 0x175   :  { %2898 = vmatpush2.bf16.msra.mxu1 %v4356_v31 }
 0x176   :  { %2899 = vmatprep.subr.bf16.mxu1 %v4361_v60 }
 0x177   :  { %2859 = vmatpush2.bf16.msra.mxu0 %v4263_v42  ;;  %v4310_v42 = vld [vmem:[#allocation8 + $0x14c] ss:$16 sps:$4 sm:$0xff]  }
 0x178   :  { %2860 = vmatprep.subr.bf16.mxu0 %v4268_v47  ;;  %v4313_v47 = vld [vmem:[#allocation8 + $0x12c] ss:$16 sps:$4 sm:$0xff]  }
 0x179   :  { %2900 = vmatpush2.bf16.msra.mxu1 %v4359_v63 }
 0x17a   :  { %2901 = vmatprep.subr.bf16.mxu1 %v4364_v5 }
 0x17b   :  { %2861 = vmatpush2.bf16.msra.mxu0 %v4266_v51 }
 0x17c   :  { %2912 = vmatprep.subr.bf16.mxu0 %v4271_v52  ;;  %v4316_v52 = vld [vmem:[#allocation8 + $0x10c] ss:$16 sps:$4 sm:$0xff]  }
 0x17d   :  { %2902 = vmatpush2.bf16.msra.mxu1 %v4362_v7 }
 0x17e   :  { %v1820_v56 = vpop.f32.mrf.mxu0  ;;  %2953 = vmatprep.subr.bf16.mxu1 %v4367_v11 }
 0x17f   :  { %v1861_v53 = vpop.f32.mrf.mxu1  ;;  %v1821_v58 = vadd.f32 %v1820_v56, %v1780_v32 }
 0x180   :  { %v1822_v49 = vpop.f32.mrf.mxu0 }
 0x181   :  { %v1863_v59 = vpop.f32.mrf.mxu1  ;;  %v1862_v61 = vadd.f32 %v1861_v53, %v1821_v58  ;;  %v1823_v45 = vadd.f32 %v1822_v49, %v1782_v57  ;;  %v414_v53 = vsub.s32 2, %v4639_v43  ;;  %v418_v57 = vsub.s32 3, %v4639_v43 }
 0x182   :  { %v1824_v0 = vpop.f32.mrf.mxu0 }
 0x183   :  { %v1865_v1 = vpop.f32.mrf.mxu1  ;;  %v1864_v48 = vadd.f32 %v1863_v59, %v1823_v45  ;;  %v2032_v2 = vmax.f32 %v1862_v61, 0.0  ;;  %v415_v58 = vrot.slane %v4701_v39, %v414_v53  ;;  %v419_v49 = vrot.slane %v4701_v39, %v418_v57  ;;  %v4365_v39 = vld [vmem:[#allocation8 + $0x2e8] ss:$16 sps:$4 sm:$0xff]  }
 0x184   :  { %v1825_v4 = vpop.f32.mrf.mxu0 }
 0x185   :  { %v1866_v46 = vpop.f32.mrf.mxu1  ;;  %v2033_v6 = vmax.f32 %v1864_v48, 0.0  ;;  %v4714_v9 = vpack.c.bf16 %v2032_v2, %v2032_v2 }
 0x187   :  { %v2037_v50 = vpack.c.bf16 %v2033_v6, %v2033_v6 }
 0x189   :  { %2862 = vmatprep.mubr.bf16.mxu0 %v2037_v50 }
 0x18a   :  { %2863 = vmatmul.mubr.bf16.vlgmr.msra.gmra.mxu0 %v4714_v9 }
 0x18b   :  { %2913 = vmatpush1.bf16.msra.mxu0 %v4269_v8  ;;  %2944 = vmatprep.mubr.bf16.mxu0 %v2037_v50 }
 0x18c   :  { %2914 = vmatprep.subr.bf16.mxu0 %v4274_v10 }
 0x18f   :  { %2915 = vmatpush1.bf16.msra.mxu0 %v4272_v12 }
 0x190   :  { %2916 = vmatprep.subr.bf16.mxu0 %v4277_v13  ;;  %v4370_v13 = vld [vmem:[#allocation8 + $0x2cc] ss:$16 sps:$4 sm:$0xff]  }
 0x193   :  { %2917 = vmatpush1.bf16.msra.mxu0 %v4275_v14  ;;  %v4368_v14 = vld [vmem:[#allocation8 + $0x2c8] ss:$16 sps:$4 sm:$0xff]  }
 0x194   :  { %2918 = vmatprep.subr.bf16.mxu0 %v4280_v15  ;;  %v4373_v15 = vld [vmem:[#allocation8 + $0x2ac] ss:$16 sps:$4 sm:$0xff]  }
 0x197   :  { %2919 = vmatpush1.bf16.msra.mxu0 %v4278_v18  ;;  %v4371_v18 = vld [vmem:[#allocation8 + $0x2a8] ss:$16 sps:$4 sm:$0xff]  }
 0x198   :  { %2920 = vmatprep.subr.bf16.mxu0 %v4283_v19  ;;  %v4376_v19 = vld [vmem:[#allocation8 + $0x28c] ss:$16 sps:$4 sm:$0xff]  }
 0x19b   :  { %2921 = vmatpush1.bf16.msra.mxu0 %v4281_v20  ;;  %v4413_v20 = vld [vmem:[#allocation10 + $0x78] sm:$0xff]  }
 0x19c   :  { %2922 = vmatprep.subr.bf16.mxu0 %v4286_v21  ;;  %v4414_v21 = vld [vmem:[#allocation10 + $0x38] sm:$0xff]  }
 0x19f   :  { %2923 = vmatpush1.bf16.msra.mxu0 %v4284_v22  ;;  %v4415_v22 = vld [vmem:[#allocation10 + $0x70] sm:$0xff]  }
 0x1a0   :  { %2924 = vmatprep.subr.bf16.mxu0 %v4289_v23  ;;  %v4374_v23 = vld [vmem:[#allocation8 + $0x288] ss:$16 sps:$4 sm:$0xff]  }
 0x1a3   :  { %2925 = vmatpush1.bf16.msra.mxu0 %v4287_v24  ;;  %v4416_v24 = vld [vmem:[#allocation10 + $0x30] sm:$0xff]  }
 0x1a4   :  { %2926 = vmatprep.subr.bf16.mxu0 %v4292_v25  ;;  %v4379_v25 = vld [vmem:[#allocation8 + $0x26c] ss:$16 sps:$4 sm:$0xff]  }
 0x1a7   :  { %2927 = vmatpush1.bf16.msra.mxu0 %v4290_v26  ;;  %v4417_v26 = vld [vmem:[#allocation10 + $0x68] sm:$0xff]  }
 0x1a8   :  { %2928 = vmatprep.subr.bf16.mxu0 %v4295_v27  ;;  %v4377_v27 = vld [vmem:[#allocation8 + $0x268] ss:$16 sps:$4 sm:$0xff]  }
 0x1ab   :  { %2929 = vmatpush2.bf16.msra.mxu0 %v4293_v28  ;;  %v4418_v28 = vld [vmem:[#allocation10 + $0x28] sm:$0xff]  }
 0x1ac   :  { %2930 = vmatprep.subr.bf16.mxu0 %v4298_v29  ;;  %v4382_v29 = vld [vmem:[#allocation8 + $0x24c] ss:$16 sps:$4 sm:$0xff]  }
 0x1af   :  { %2931 = vmatpush2.bf16.msra.mxu0 %v4296_v30  ;;  %v4419_v30 = vld [vmem:[#allocation10 + $0x60] sm:$0xff]  }
 0x1b0   :  { %2932 = vmatprep.subr.bf16.mxu0 %v4301_v33  ;;  %v4380_v33 = vld [vmem:[#allocation8 + $0x248] ss:$16 sps:$4 sm:$0xff]  }
 0x1b3   :  { %2933 = vmatpush2.bf16.msra.mxu0 %v4299_v34  ;;  %v4420_v34 = vld [vmem:[#allocation10 + $0x20] sm:$0xff]  }
 0x1b4   :  { %2934 = vmatprep.subr.bf16.mxu0 %v4304_v35  ;;  %v4385_v35 = vld [vmem:[#allocation8 + $0x22c] ss:$16 sps:$4 sm:$0xff]  }
 0x1b7   :  { %2935 = vmatpush2.bf16.msra.mxu0 %v4302_v36  ;;  %v4421_v36 = vld [vmem:[#allocation10 + $0x58] sm:$0xff]  }
 0x1b8   :  { %2936 = vmatprep.subr.bf16.mxu0 %v4307_v37  ;;  %v4383_v37 = vld [vmem:[#allocation8 + $0x228] ss:$16 sps:$4 sm:$0xff]  }
 0x1bb   :  { %2937 = vmatpush2.bf16.msra.mxu0 %v4305_v40  ;;  %v4422_v40 = vld [vmem:[#allocation10 + $0x18] sm:$0xff]  }
 0x1bc   :  { %2938 = vmatprep.subr.bf16.mxu0 %v4310_v42  ;;  %v4388_v42 = vld [vmem:[#allocation8 + $0x20c] ss:$16 sps:$4 sm:$0xff]  }
 0x1be   :  { %v1902_v62 = vpop.f32.mrf.mxu0 }
 0x1bf   :  { %v1943_v3 = vpop.f32.mrf.mxu1  ;;  %2939 = vmatpush2.bf16.msra.mxu0 %v4308_v44  ;;  %v1903_v59 = vadd.f32 %v1902_v62, %v415_v58  ;;  %v4423_v44 = vld [vmem:[#allocation10 + $0x50] sm:$0xff]   ;;  %v4406_v58 = vld [vmem:[#allocation8 + $0x34c] ss:$16 sps:$4 sm:$0xff]  }
 0x1c0   :  { %v1904_v51 = vpop.f32.mrf.mxu0  ;;  %2940 = vmatprep.subr.bf16.mxu0 %v4313_v47  ;;  %v4386_v47 = vld [vmem:[#allocation8 + $0x208] ss:$16 sps:$4 sm:$0xff]   ;;  %v4424_v62 = vld [vmem:[#allocation10 + $0x10] sm:$0xff]  }
 0x1c1   :  { %v1945_v17 = vpop.f32.mrf.mxu1  ;;  %v1905_v60 = vadd.f32 %v1904_v51, %v419_v49  ;;  %v1944_v61 = vadd.f32 %v1943_v3, %v1903_v59  ;;  %v4391_v3 = vld [vmem:[#allocation8 + $0x3ec] ss:$16 sps:$4 sm:$0xff]   ;;  %v4404_v49 = vld [vmem:[#allocation8 + $0x348] ss:$16 sps:$4 sm:$0xff]  }
 0x1c2   :  { %v1906_v54 = vpop.f32.mrf.mxu0  ;;  %v4394_v51 = vld [vmem:[#allocation8 + $0x3cc] ss:$16 sps:$4 sm:$0xff]  }
 0x1c3   :  { %v1947_v31 = vpop.f32.mrf.mxu1  ;;  %2941 = vmatpush2.bf16.msra.mxu0 %v4311_v16  ;;  %v1946_v0 = vadd.f32 %v1945_v17, %v1905_v60  ;;  %v4389_v16 = vld [vmem:[#allocation8 + $0x3e8] ss:$16 sps:$4 sm:$0xff]   ;;  %v4409_v59 = vld [vmem:[#allocation8 + $0x32c] ss:$16 sps:$4 sm:$0xff]  }
 0x1c4   :  { %v1907_v32 = vpop.f32.mrf.mxu0  ;;  %2942 = vmatprep.subr.bf16.mxu0 %v4316_v52  ;;  %v4392_v17 = vld [vmem:[#allocation8 + $0x3c8] ss:$16 sps:$4 sm:$0xff]   ;;  %v4397_v52 = vld [vmem:[#allocation8 + $0x3ac] ss:$16 sps:$4 sm:$0xff]  }
 0x1c5   :  { %v1948_v56 = vpop.f32.mrf.mxu1  ;;  %v4395_v54 = vld [vmem:[#allocation8 + $0x3a8] ss:$16 sps:$4 sm:$0xff]   ;;  %v4400_v31 = vld [vmem:[#allocation8 + $0x38c] ss:$16 sps:$4 sm:$0xff]  }
 0x1c6   :  { %v4403_v32 = vld [vmem:[#allocation8 + $0x36c] ss:$16 sps:$4 sm:$0xff]   ;;  %v4401_v56 = vld [vmem:[#allocation8 + $0x368] ss:$16 sps:$4 sm:$0xff]  }
 0x1c7   :  { %2943 = vmatpush2.bf16.msra.mxu0 %v4314_v55  ;;  %v4398_v55 = vld [vmem:[#allocation8 + $0x388] ss:$16 sps:$4 sm:$0xff]  }
 0x1c8   :  { %3780 = vmatprep.subr.bf16.mxu0 %v4413_v20  ;;  %v4407_v60 = vld [vmem:[#allocation8 + $0x328] ss:$16 sps:$4 sm:$0xff]  }
 0x1c9   :  { %v4442_v20 = vld [vmem:[#allocation10 + $0x88] sm:$0xff]  }
 0x1ca   :  { %2945 = vmatmul.mubr.bf16.vlgmr.msra.gmra.mxu0 %v4714_v9 }
 0x1cb   :  { %3781 = vmatpush3.bf16.msra.mxu0 %v4414_v21 }
 0x1cc   :  { %3782 = vmatprep.subr.bf16.mxu0 %v4415_v22 }
 0x1cf   :  { %3783 = vmatpush3.bf16.msra.mxu0 %v4416_v24  ;;  %v4444_v24 = vld [vmem:[#allocation10 + $0x80] sm:$0xff]  }
 0x1d0   :  { %3784 = vmatprep.subr.bf16.mxu0 %v4417_v26  ;;  %v2168_v26 = vld [vmem:[%s4751_s4] sm:$0xf] }
 0x1d3   :  { %3785 = vmatpush3.bf16.msra.mxu0 %v4418_v28  ;;  %v2177_v28 = vrot.slane %v2168_v26, %v410_v41  ;;  %v2185_v41 = vrot.slane %v2168_v26, %v418_v57  ;;  %v3747_v57 = vld [vmem:[%s4753_s6] ss:$0 sm:$0xff] }
 0x1d4   :  { %3786 = vmatprep.subr.bf16.mxu0 %v4419_v30 }
 0x1d7   :  { %3787 = vmatpush3.bf16.msra.mxu0 %v4420_v34 }
 0x1d8   :  { %3788 = vmatprep.subr.bf16.mxu0 %v4421_v36 }
 0x1db   :  { %3789 = vmatpush3.bf16.msra.mxu0 %v4422_v40 }
 0x1dc   :  { %3790 = vmatprep.subr.bf16.mxu0 %v4423_v44 }
 0x1df   :  { %3791 = vmatpush3.bf16.msra.mxu0 %v4424_v62 }
 0x1fe   :  { %v1984_v45 = vpop.f32.mrf.mxu0 }
 0x1ff   :  { %v2025_v63 = vpop.f32.mrf.mxu1  ;;  %v1985_v1 = vadd.f32 %v1984_v45, %v1944_v61  ;;  %v4412_v61 = vld [vmem:[#allocation8 + $0x30c] ss:$16 sps:$4 sm:$0xff]   ;;  %v4410_v45 = vld [vmem:[#allocation8 + $0x308] ss:$16 sps:$4 sm:$0xff]  }
 0x200   :  { %v1986_v48 = vpop.f32.mrf.mxu0 }
 0x201   :  { %v2027_v2 = vpop.f32.mrf.mxu1  ;;  %v2026_v4 = vadd.f32 %v2025_v63, %v1985_v1  ;;  %v1987_v46 = vadd.f32 %v1986_v48, %v1946_v0  ;;  %v4425_v0 = vld [vmem:[#allocation10 + $0x48] sm:$0xff]  }
 0x202   :  { %v1988_v5 = vpop.f32.mrf.mxu0  ;;  %v4426_v48 = vld [vmem:[#allocation10 + $0x8] sm:$0xff]   ;;  %3792 = vmatprep.subr.bf16.mxu0 %v4425_v0 }
 0x203   :  { %v2029_v6 = vpop.f32.mrf.mxu1  ;;  %v2028_v7 = vadd.f32 %v2027_v2, %v1987_v46  ;;  %v2034_v50 = vmax.f32 %v2026_v4, 0.0  ;;  %3793 = vmatpush3.bf16.msra.mxu0 %v4426_v48  ;;  %v4427_v4 = vld [vmem:[#allocation10 + $0x40] sm:$0xff]  }
 0x204   :  { %v1989_v8 = vpop.f32.mrf.mxu0  ;;  %v4428_v5 = vld [vmem:[#allocation10] sm:$0xff]   ;;  %3794 = vmatprep.subr.bf16.mxu0 %v4427_v4  ;;  %v4429_v6 = vld [vmem:[#allocation10 + $0xf8] sm:$0xff]  }
 0x205   :  { %v2030_v9 = vpop.f32.mrf.mxu1  ;;  %v2035_v10 = vmax.f32 %v2028_v7, 0.0  ;;  %v4726_v12 = vpack.c.bf16 %v2034_v50, %v2034_v50  ;;  %v4430_v7 = vld [vmem:[#allocation10 + $0xb8] sm:$0xff]   ;;  %v4431_v50 = vld [vmem:[#allocation10 + $0xf0] sm:$0xff]  }
 0x206   :  { %v4432_v8 = vld [vmem:[#allocation10 + $0xb0] sm:$0xff]   ;;  %v4433_v9 = vld [vmem:[#allocation10 + $0xe8] sm:$0xff]  }
 0x207   :  { %v2039_v11 = vpack.c.bf16 %v2035_v10, %v2035_v10  ;;  %3795 = vmatpush3.bf16.msra.mxu0 %v4428_v5  ;;  %v4434_v10 = vld [vmem:[#allocation10 + $0xa8] sm:$0xff]  }
 0x209   :  { %2903 = vmatprep.mubr.bf16.mxu1 %v2039_v11 }
 0x20a   :  { %2904 = vmatmul.mubr.bf16.vlgmr.msra.gmra.mxu1 %v4726_v12 }
 0x20b   :  { %2954 = vmatpush1.bf16.msra.mxu1 %v4365_v39  ;;  %2985 = vmatprep.mubr.bf16.mxu1 %v2039_v11  ;;  %v4435_v11 = vld [vmem:[#allocation10 + $0xe0] sm:$0xff]  }
 0x20c   :  { %2955 = vmatprep.subr.bf16.mxu1 %v4370_v13  ;;  %v4436_v39 = vld [vmem:[#allocation10 + $0xa0] sm:$0xff]   ;;  %v4438_v13 = vld [vmem:[#allocation10 + $0x98] sm:$0xff]  }
 0x20f   :  { %2956 = vmatpush1.bf16.msra.mxu1 %v4368_v14  ;;  %v4439_v14 = vld [vmem:[#allocation10 + $0xd0] sm:$0xff]  }
 0x210   :  { %2957 = vmatprep.subr.bf16.mxu1 %v4373_v15  ;;  %v4440_v15 = vld [vmem:[#allocation10 + $0x90] sm:$0xff]  }
 0x213   :  { %2958 = vmatpush1.bf16.msra.mxu1 %v4371_v18 }
 0x214   :  { %2959 = vmatprep.subr.bf16.mxu1 %v4376_v19  ;;  %v4441_v19 = vld [vmem:[#allocation10 + $0xc8] sm:$0xff]  }
 0x217   :  { %2960 = vmatpush1.bf16.msra.mxu1 %v4374_v23  ;;  %v4443_v23 = vld [vmem:[#allocation10 + $0xc0] sm:$0xff]  }
 0x218   :  { %2961 = vmatprep.subr.bf16.mxu1 %v4379_v25 }
 0x21b   :  { %2962 = vmatpush1.bf16.msra.mxu1 %v4377_v27  ;;  %v2173_v27 = vrot.slane %v2168_v26, %v406_v38  ;;  %v2181_v38 = vrot.slane %v2168_v26, %v414_v53 }
 0x21c   :  { %2963 = vmatprep.subr.bf16.mxu1 %v4382_v29 }
 0x21f   :  { %2964 = vmatpush1.bf16.msra.mxu1 %v4380_v33 }
 0x220   :  { %2965 = vmatprep.subr.bf16.mxu1 %v4385_v35 }
 0x223   :  { %2966 = vmatpush1.bf16.msra.mxu1 %v4383_v37 }
 0x224   :  { %2967 = vmatprep.subr.bf16.mxu1 %v4388_v42 }
 0x227   :  { %2968 = vmatpush1.bf16.msra.mxu1 %v4386_v47 }
 0x228   :  { %2969 = vmatprep.subr.bf16.mxu1 %v4391_v3 }
 0x22b   :  { %2970 = vmatpush2.bf16.msra.mxu1 %v4389_v16 }
 0x22c   :  { %2971 = vmatprep.subr.bf16.mxu1 %v4394_v51 }
 0x22f   :  { %2972 = vmatpush2.bf16.msra.mxu1 %v4392_v17 }
 0x230   :  { %2973 = vmatprep.subr.bf16.mxu1 %v4397_v52 }
 0x233   :  { %2974 = vmatpush2.bf16.msra.mxu1 %v4395_v54 }
 0x234   :  { %2975 = vmatprep.subr.bf16.mxu1 %v4400_v31 }
 0x237   :  { %2976 = vmatpush2.bf16.msra.mxu1 %v4398_v55 }
 0x238   :  { %2977 = vmatprep.subr.bf16.mxu1 %v4403_v32 }
 0x23b   :  { %2978 = vmatpush2.bf16.msra.mxu1 %v4401_v56 }
 0x23c   :  { %2979 = vmatprep.subr.bf16.mxu1 %v4406_v58 }
 0x23f   :  { %2980 = vmatpush2.bf16.msra.mxu1 %v4404_v49 }
 0x240   :  { %2981 = vmatprep.subr.bf16.mxu1 %v4409_v59 }
 0x243   :  { %2982 = vmatpush2.bf16.msra.mxu1 %v4407_v60 }
 0x244   :  { %2983 = vmatprep.subr.bf16.mxu1 %v4412_v61 }
 0x247   :  { %2984 = vmatpush2.bf16.msra.mxu1 %v4410_v45 }
 0x248   :  { %3802 = vmatprep.subr.bf16.mxu1 %v4429_v6 }
 0x24a   :  { %2986 = vmatmul.mubr.bf16.vlgmr.msra.gmra.mxu1 %v4726_v12  ;;  %v2864_v63 = vpop.f32.mrf.mxu0  ;;  %v4437_v12 = vld [vmem:[#allocation10 + $0xd8] sm:$0xff]  }
 0x24b   :  { %3803 = vmatpush3.bf16.msra.mxu1 %v4430_v7  ;;  %v2865_v29 = vadd.f32 %v2864_v63, %v2173_v27 }
 0x24c   :  { %v2866_v1 = vpop.f32.mrf.mxu0  ;;  %3804 = vmatprep.subr.bf16.mxu1 %v4431_v50 }
 0x24d   :  { %v2867_v33 = vadd.f32 %v2866_v1, %v2177_v28 }
 0x24e   :  { %v2868_v2 = vpop.f32.mrf.mxu0 }
 0x24f   :  { %3805 = vmatpush3.bf16.msra.mxu1 %v4432_v8 }
 0x250   :  { %v2869_v46 = vpop.f32.mrf.mxu0  ;;  %3806 = vmatprep.subr.bf16.mxu1 %v4433_v9 }
 0x253   :  { %3807 = vmatpush3.bf16.msra.mxu1 %v4434_v10 }
 0x254   :  { %3808 = vmatprep.subr.bf16.mxu1 %v4435_v11 }
 0x257   :  { %3809 = vmatpush3.bf16.msra.mxu1 %v4436_v39 }
 0x258   :  { %3810 = vmatprep.subr.bf16.mxu1 %v4437_v12 }
 0x25b   :  { %3811 = vmatpush3.bf16.msra.mxu1 %v4438_v13 }
 0x25c   :  { %3812 = vmatprep.subr.bf16.mxu1 %v4439_v14 }
 0x25f   :  { %3813 = vmatpush3.bf16.msra.mxu1 %v4440_v15 }
 0x260   :  { %3814 = vmatprep.subr.bf16.mxu1 %v4441_v19 }
 0x263   :  { %3815 = vmatpush3.bf16.msra.mxu1 %v4442_v20 }
 0x264   :  { %3816 = vmatprep.subr.bf16.mxu1 %v4443_v23 }
 0x267   :  { %3817 = vmatpush3.bf16.msra.mxu1 %v4444_v24 }
 0x28a   :  { %v2946_v18 = vpop.f32.mrf.mxu0 }
 0x28b   :  { %v2947_v3 = vadd.f32 %v2946_v18, %v2181_v38 }
 0x28c   :  { %v2948_v21 = vpop.f32.mrf.mxu0 }
 0x28d   :  { %v2949_v51 = vadd.f32 %v2948_v21, %v2185_v41 }
 0x28e   :  { %v2950_v22 = vpop.f32.mrf.mxu0 }
 0x290   :  { %v2951_v25 = vpop.f32.mrf.mxu0 }
 0x2ca   :  { %v2905_v30 = vpop.f32.mrf.mxu1 }
 0x2cb   :  { %v2906_v34 = vadd.f32 %v2905_v30, %v2865_v29 }
 0x2cc   :  { %v2907_v35 = vpop.f32.mrf.mxu1 }
 0x2cd   :  { %v2908_v36 = vadd.f32 %v2907_v35, %v2867_v33  ;;  %v2994_v37 = vmax.f32 %v2906_v34, 0.0 }
 0x2ce   :  { %v2909_v40 = vpop.f32.mrf.mxu1 }
 0x2cf   :  { %v2995_v42 = vmax.f32 %v2908_v36, 0.0  ;;  %v2998_v62 = vpack.c.bf16 %v2994_v37, %v2994_v37 }
 0x2d0   :  { %v2910_v44 = vpop.f32.mrf.mxu1 }
 0x2d1   :  { %v2999_v47 = vpack.c.bf16 %v2995_v42, %v2995_v42 }
 0x2d3   :  { %3297 = vmatprep.mubr.bf16.mxu0 %v2999_v47 }
 0x2d4   :  { %3298 = vmatmul.mubr.bf16.vlgmr.msra.gmra.mxu0 %v2998_v62 }
 0x30a   :  { %v2987_v16 = vpop.f32.mrf.mxu1 }
 0x30b   :  { %v2988_v17 = vadd.f32 %v2987_v16, %v2947_v3 }
 0x30c   :  { %v2989_v52 = vpop.f32.mrf.mxu1 }
 0x30d   :  { %v2990_v54 = vadd.f32 %v2989_v52, %v2949_v51  ;;  %v2996_v31 = vmax.f32 %v2988_v17, 0.0 }
 0x30e   :  { %v2991_v55 = vpop.f32.mrf.mxu1 }
 0x30f   :  { %v2997_v32 = vmax.f32 %v2990_v54, 0.0  ;;  %v3000_v49 = vpack.c.bf16 %v2996_v31, %v2996_v31 }
 0x310   :  { %v2992_v56 = vpop.f32.mrf.mxu1 }
 0x311   :  { %v3001_v58 = vpack.c.bf16 %v2997_v32, %v2997_v32 }
 0x313   :  { %3337 = vmatprep.mubr.bf16.mxu1 %v3001_v58 }
 0x314   :  { %3338 = vmatmul.mubr.bf16.vlgmr.msra.gmra.mxu1 %v3000_v49 }
 0x394   :  { %v3796_v59 = vpop.f32.mrf.mxu0 }
 0x396   :  { %v3797_v60 = vpop.f32.mrf.mxu0 }
 0x397   :  { %v3798_v43 = vadd.f32 %v3797_v60, %v3796_v59 }
 0x398   :  { %v3799_v53 = vpop.f32.mrf.mxu0 }
 0x399   :  { %v3300_v0 = vadd.f32 %v3798_v43, %v3747_v57 }
 0x39a   :  { %v3800_v61 = vpop.f32.mrf.mxu0 }
 0x3d4   :  { %v3818_v45 = vpop.f32.mrf.mxu1 }
 0x3d6   :  { %v3819_v63 = vpop.f32.mrf.mxu1 }
 0x3d7   :  { %v3820_v1 = vadd.f32 %v3819_v63, %v3818_v45 }
 0x3d8   :  { %v3821_v48 = vpop.f32.mrf.mxu1 }
 0x3d9   :  { %v3340_v2 = vadd.f32 %v3820_v1, %v3300_v0 }
 0x3da   :  { %v3822_v4 = vpop.f32.mrf.mxu1 }
 0x3db   :  { %3345 = vst [vmem:[#allocation11] sm:$0x3] %v3340_v2 }
 0x3dc   :  { %4556 = shalt.err (!%p4553_p1)
}
 0x3dd   :  { %3355 = dma.vmem_to_hbm [thread:$0]  %s3353_s29, 32, %s4754_s7, [#allocation4]  }
 0x3de   :  { %4571 = dma.done.wait [#allocation4], 32  }
 0x3df   :  { %4572 = vsyncadd [#allocation4], 4294967264 }
 0x3e0   :  { %3359 = vsyncpa [#allocation3], 1 }
 0x3e1   :  { %3360 = vsyncpa [#allocation6], 1 }
 0x3e2   :  { %3361 = vsyncpa [#allocation9], 1 }
 0x3e3   :  { %3362 = vsyncpa [#allocation4], 1 }

</bundles_post_ra>
